<compile_context>
chip_gen: v7x
topology: tpu7x:2x2x1
jax: 0.10.0
libtpu: 0.0.40
codegen_flags: <defaults>
</compile_context>

<pallas_src>
import math
from functools import partial

import jax
import jax.numpy as jnp
from jax.experimental import pallas as pl
from jax.experimental.pallas import tpu as pltpu  # noqa: F401  (TPU backend assumed)

# ------------------------- model dimensions (small, synthetic) -------------------------
B = 2                                  # batch
L = 8                                  # sequence length
D = 32                                 # model dim (Block `dim`)
D_INNER = 2 * D                        # Mamba expand = 2  -> 64
D_STATE = 16                           # Mamba d_state
D_CONV = 4                             # Mamba d_conv
DT_RANK = max(1, math.ceil(D / 16))    # = 2
PROJ_W = D_INNER + 2 * D_STATE         # fused [dt | B | C] projection width = 96
EPS = 1e-5                             # nn.LayerNorm default eps

LB = B * L                             # 16 token rows (batch-major: row = b*L + t)
LANES = B * D_INNER                    # 128 scan lanes (lane = b*D_INNER + d)

# packed aux rows (each per-channel vector tiled x B across the 128 lanes)
ROW_CONV_B, ROW_DT_B, ROW_DSKIP = 0, 1, 2
ROW_CONV_W0 = 3                        # rows 3..6 = conv taps k=0..3
ROW_LN_W, ROW_LN_B = 7, 8              # LayerNorm weight / bias in lanes [0:D]
AUX_ROWS = 9


# ------------------------- fused Block kernel (single invocation, no grid) -------------------------
def _block_kernel(add_residual, *refs):
    if add_residual:
        (h_ref, r_ref, win_ref, wproj_ref, at_ref, wout_ref, aux_ref,
         hid_ref, res_ref) = refs
    else:
        (h_ref, win_ref, wproj_ref, at_ref, wout_ref, aux_ref,
         hid_ref, res_ref) = refs

    # ---- fused residual-add + LayerNorm (residual_in_fp32) ----
    h = h_ref[...]                                              # (LB, D) f32, rows b*L+t
    res = h + r_ref[...] if add_residual else h                 # drop_path = Identity
    res_ref[...] = res

    ln_w = aux_ref[ROW_LN_W:ROW_LN_W + 1, :D]                   # (1, D)
    ln_b = aux_ref[ROW_LN_B:ROW_LN_B + 1, :D]
    mean = jnp.mean(res, axis=-1, keepdims=True)
    cent = res - mean
    var = jnp.mean(cent * cent, axis=-1, keepdims=True)
    normed = cent * jax.lax.rsqrt(var + EPS) * ln_w + ln_b      # (LB, D)

    # ---- in_proj (no bias): bf16 operands, f32 accumulation ----
    xz = jnp.dot(normed.astype(jnp.bfloat16), win_ref[...],
                 preferred_element_type=jnp.float32)            # (LB, 2*D_INNER)
    x = xz[:, :D_INNER]                                         # (LB, D_INNER)
    z = xz[:, D_INNER:]                                         # (LB, D_INNER)

    # ---- causal depthwise conv1d along time (batch-major rows), then SiLU ----
    # xc[b,t] = sum_k w[k] * x[b, t-3+k] ; timesteps t-3+k < 0 are zero (left pad).
    row = jax.lax.broadcasted_iota(jnp.int32, (LB, 1), 0)
    tpos = jnp.bitwise_and(row, L - 1)                          # t = row mod L (L = 2^k)
    xpad = jnp.concatenate(
        [jnp.zeros((D_CONV - 1, D_INNER), jnp.float32), x], axis=0)   # (LB+3, D_INNER)
    xc = x * aux_ref[ROW_CONV_W0 + D_CONV - 1:ROW_CONV_W0 + D_CONV, :D_INNER]  # k = 3 tap
    for k in range(D_CONV - 1):                                 # k = 0, 1, 2 (static)
        need = D_CONV - 1 - k
        term = xpad[k:k + LB, :] * aux_ref[ROW_CONV_W0 + k:ROW_CONV_W0 + k + 1, :D_INNER]
        xc = xc + jnp.where(tpos >= need, term, 0.0)            # mask batch-boundary leak
    xc = xc + aux_ref[ROW_CONV_B:ROW_CONV_B + 1, :D_INNER]
    xc = xc * jax.nn.sigmoid(xc)                                # SiLU, (LB, D_INNER)

    # ---- fused x_proj + dt_proj: one matmul -> [dt(64) | B(16) | C(16)] ----
    x_dbl = jnp.dot(xc.astype(jnp.bfloat16), wproj_ref[...],
                    preferred_element_type=jnp.float32)         # (LB, PROJ_W)
    dt = jax.nn.softplus(x_dbl[:, :D_INNER]
                         + aux_ref[ROW_DT_B:ROW_DT_B + 1, :D_INNER])   # (LB, D_INNER)
    Bm = x_dbl[:, D_INNER:D_INNER + D_STATE]                    # (LB, D_STATE)
    Cm = x_dbl[:, D_INNER + D_STATE:]                           # (LB, D_STATE)

    # ---- pack batch into the lane axis for the scan: (L, B*D_INNER) = (8, 128) ----
    def pack_rows(m):                                           # (LB, D_INNER) -> (L, LANES)
        return jnp.concatenate([m[b * L:(b + 1) * L, :] for b in range(B)], axis=1)

    dt_s = pack_rows(dt)                                        # (L, 128)
    xc_s = pack_rows(xc)                                        # (L, 128)
    du_s = dt_s * xc_s                                          # (L, 128)

    # hoisted exp (one EUP pass) and hoisted B/C lane-broadcasts (off the serial path)
    dA_all = jnp.exp(dt_s[:, None, :] * at_ref[...][None, :, :])       # (L, D_STATE, 128)
    dBu_halves, c_halves = [], []
    for b in range(B):                                          # static, B = 2
        rows = slice(b * L, (b + 1) * L)
        lanes = slice(b * D_INNER, (b + 1) * D_INNER)
        dBu_halves.append(du_s[:, lanes][:, None, :] * Bm[rows, :][:, :, None])
        c_halves.append(jnp.broadcast_to(Cm[rows, :][:, :, None],
                                         (L, D_STATE, D_INNER)))
    dBu_all = jnp.concatenate(dBu_halves, axis=2)               # (L, D_STATE, 128)
    C_s = jnp.concatenate(c_halves, axis=2)                     # (L, D_STATE, 128)

    # ---- selective scan: full 128-lane state, C-contraction fused into the loop ----
    hstate = jnp.zeros((D_STATE, LANES), jnp.float32)
    ys = []
    for t in range(L):                                          # static unroll, L small
        hstate = dA_all[t] * hstate + dBu_all[t]
        ys.append(jnp.sum(hstate * C_s[t], axis=0, keepdims=True))     # (1, 128)
    y_s = jnp.concatenate(ys, axis=0)                           # (L, 128)

    y_s = y_s + xc_s * aux_ref[ROW_DSKIP:ROW_DSKIP + 1, :]      # + u * D (skip)

    # ---- unpack to token rows, gate with SiLU(z), out_proj ----
    y = jnp.concatenate([y_s[:, b * D_INNER:(b + 1) * D_INNER] for b in range(B)],
                        axis=0)                                 # (LB, D_INNER)
    y = y * (z * jax.nn.sigmoid(z))
    hid_ref[...] = jnp.dot(y.astype(jnp.bfloat16), wout_ref[...],
                           preferred_element_type=jnp.float32)  # (LB, D)


def fused_block(hidden, residual, p):
    add_residual = residual is not None
    args = [hidden.reshape(LB, D)]                              # batch-major token rows
    if add_residual:
        args.append(residual.reshape(LB, D))
    args += [p['win_t'], p['wproj_t'], p['a_tiled'], p['wout_t'], p['aux']]

    hid2d, res2d = pl.pallas_call(
        partial(_block_kernel, add_residual),
        out_shape=(jax.ShapeDtypeStruct((LB, D), jnp.float32),   # mixer output
                   jax.ShapeDtypeStruct((LB, D), jnp.float32)),  # residual out (fp32)
    )(*args)
    return hid2d.reshape(B, L, D), res2d.reshape(B, L, D)


@jax.jit
def block_forward(hidden_states, residual, params):
    """Returns (hidden_states_out, residual_out), matching Block.forward semantics."""
    return fused_block(hidden_states, residual, params)


# ------------------------- parameters (deterministic, shapes from __init__) -------------------------
def init_params(key):
    ks = jax.random.split(key, 8)
    scale = 0.1
    win = jax.random.normal(ks[0], (2 * D_INNER, D), jnp.float32) * scale      # in_proj.weight
    conv_w = jax.random.normal(ks[1], (D_INNER, D_CONV), jnp.float32) * scale  # conv1d.weight
    conv_b = jax.random.normal(ks[2], (D_INNER,), jnp.float32) * scale         # conv1d.bias
    wx = jax.random.normal(ks[3], (DT_RANK + 2 * D_STATE, D_INNER), jnp.float32) * scale
    wdt = jax.random.normal(ks[4], (D_INNER, DT_RANK), jnp.float32) * scale    # dt_proj.weight
    bdt = jax.random.normal(ks[5], (D_INNER,), jnp.float32) * scale + 0.5      # dt_proj.bias
    a_log = jnp.log(jnp.broadcast_to(
        jnp.arange(1, D_STATE + 1, dtype=jnp.float32), (D_INNER, D_STATE)))    # A_log init
    d_skip = jnp.ones((D_INNER,), jnp.float32)                                 # D init
    wout = jax.random.normal(ks[6], (D, D_INNER), jnp.float32) * scale         # out_proj.weight
    ln_w = jnp.ones((D,), jnp.float32)
    ln_b = jnp.zeros((D,), jnp.float32)

    raw = dict(win=win, conv_w=conv_w, conv_b=conv_b, wx=wx, wdt=wdt, bdt=bdt,
               a_log=a_log, d_skip=d_skip, wout=wout, ln_w=ln_w, ln_b=ln_b)

    # A^T tiled across the B lane groups: (D_STATE, B*D_INNER)
    a = -jnp.exp(a_log)                                          # (D_INNER, D_STATE)
    a_tiled = jnp.tile(jnp.transpose(a), (1, B))                 # (D_STATE, 128)

    # fold dt_proj into x_proj: one matmul emits [dt(64) | B(16) | C(16)]
    wx_t = jnp.transpose(wx)                                     # (D_INNER, DT_RANK+2*D_STATE)
    w_dt_fused = wx_t[:, :DT_RANK] @ jnp.transpose(wdt)          # (D_INNER, D_INNER)
    wproj_t = jnp.concatenate([w_dt_fused, wx_t[:, DT_RANK:]], axis=1)   # (D_INNER, PROJ_W)

    # packed aux: per-channel vectors tiled x B (used at 64 or 128 lanes) + LN params
    def tile_b(v):
        return jnp.tile(v, (B,))                                 # (64,) -> (128,)
    aux = jnp.zeros((AUX_ROWS, LANES), jnp.float32)
    aux = aux.at[ROW_CONV_B].set(tile_b(conv_b))
    aux = aux.at[ROW_DT_B].set(tile_b(bdt))
    aux = aux.at[ROW_DSKIP].set(tile_b(d_skip))
    for k in range(D_CONV):
        aux = aux.at[ROW_CONV_W0 + k].set(tile_b(conv_w[:, k]))
    aux = aux.at[ROW_LN_W, :D].set(ln_w)
    aux = aux.at[ROW_LN_B, :D].set(ln_b)

    packed = dict(
        win_t=jnp.transpose(win).astype(jnp.bfloat16),           # (D, 2*D_INNER)
        wproj_t=wproj_t.astype(jnp.bfloat16),                    # (D_INNER, PROJ_W)
        a_tiled=a_tiled,                                         # (D_STATE, 128) f32
        wout_t=jnp.transpose(wout).astype(jnp.bfloat16),         # (D_INNER, D)
        aux=aux,                                                 # (AUX_ROWS, 128) f32
    )
    return packed, raw


# ------------------------- pure-JAX f32 reference (Block.forward spec) -------------------------
def reference_block_forward(hidden, residual, raw):
    res = hidden if residual is None else residual + hidden
    mean = jnp.mean(res, axis=-1, keepdims=True)
    var = jnp.mean((res - mean) ** 2, axis=-1, keepdims=True)
    normed = (res - mean) / jnp.sqrt(var + EPS) * raw['ln_w'] + raw['ln_b']

    xz = jnp.einsum('bld,ed->ble', normed, raw['win'])
    x, z = xz[..., :D_INNER], xz[..., D_INNER:]
    xpad = jnp.pad(x, ((0, 0), (D_CONV - 1, 0), (0, 0)))
    xc = raw['conv_b'] + sum(xpad[:, k:k + L, :] * raw['conv_w'][:, k]
                             for k in range(D_CONV))
    xc = xc * jax.nn.sigmoid(xc)

    x_dbl = jnp.einsum('blc,ec->ble', xc, raw['wx'])
    dt = jax.nn.softplus(jnp.einsum('blr,cr->blc', x_dbl[..., :DT_RANK], raw['wdt'])
                         + raw['bdt'])
    Bm = x_dbl[..., DT_RANK:DT_RANK + D_STATE]
    Cm = x_dbl[..., DT_RANK + D_STATE:]
    A = -jnp.exp(raw['a_log'])                                   # (D_INNER, D_STATE)

    def scan_one(xc_b, dt_b, B_b, C_b):
        def step(h, inp):
            xc_t, dt_t, B_t, C_t = inp
            h = jnp.exp(dt_t[:, None] * A) * h + (dt_t * xc_t)[:, None] * B_t[None, :]
            return h, (h * C_t[None, :]).sum(-1)
        _, ys = jax.lax.scan(step, jnp.zeros((D_INNER, D_STATE), jnp.float32),
                             (xc_b, dt_b, B_b, C_b))
        return ys                                                # (L, D_INNER)

    y = jax.vmap(scan_one)(xc, dt, Bm, Cm)
    y = y + xc * raw['d_skip']
    y = y * (z * jax.nn.sigmoid(z))
    out = jnp.einsum('blc,dc->bld', y, raw['wout'])
    return out, res


if __name__ == "__main__":
    key = jax.random.PRNGKey(0)
    kx, kr, kp = jax.random.split(key, 3)
    packed, raw = init_params(kp)

    hidden = jax.random.normal(kx, (B, L, D), jnp.float32)
    residual = jax.random.normal(kr, (B, L, D), jnp.float32)

    # regular block (residual provided)
    h_out, r_out = block_forward(hidden, residual, packed)
    jax.block_until_ready((h_out, r_out))

    # first block (residual is None): residual_out == hidden_states
    h0, r0 = block_forward(hidden, None, packed)
    jax.block_until_ready((h0, r0))

    # validate against pure-JAX reference (bf16 MXU operands -> explicit tolerance)
    ref_h, ref_r = reference_block_forward(hidden, residual, raw)
    ref_h0, ref_r0 = reference_block_forward(hidden, None, raw)

    assert h_out.shape == (B, L, D) and r_out.shape == (B, L, D)
    assert bool(jnp.all(jnp.isfinite(h_out))) and bool(jnp.all(jnp.isfinite(r_out)))
    assert bool(jnp.allclose(r_out, hidden + residual, atol=1e-6))
    assert bool(jnp.allclose(r0, hidden, atol=1e-6))
    assert bool(jnp.allclose(h_out, ref_h, rtol=5e-2, atol=1e-2))
    assert bool(jnp.allclose(h0, ref_h0, rtol=5e-2, atol=1e-2))
    print("KERNEL_OK")
</pallas_src>

<mosaic_0001>
module attributes {stable_mosaic.version = 11 : i64} {
  func.func @_block_kernel(%arg0: memref<16x32xf32, #tpu.memory_space<vmem>>, %arg1: memref<16x32xf32, #tpu.memory_space<vmem>>, %arg2: memref<32x128xbf16, #tpu.memory_space<vmem>>, %arg3: memref<64x96xbf16, #tpu.memory_space<vmem>>, %arg4: memref<16x128xf32, #tpu.memory_space<vmem>>, %arg5: memref<64x32xbf16, #tpu.memory_space<vmem>>, %arg6: memref<9x128xf32, #tpu.memory_space<vmem>>, %arg7: memref<16x32xf32, #tpu.memory_space<vmem>>, %arg8: memref<16x32xf32, #tpu.memory_space<vmem>>) attributes {dimension_semantics = [], scalar_prefetch = 0 : i64, scratch_operands = 0 : i64, tpu.core_type = #tpu.core_type<tc>} {
    %c0 = arith.constant 0 : index
    %c0_0 = arith.constant 0 : index
    %0 = vector.load %arg0[%c0, %c0_0] : memref<16x32xf32, #tpu.memory_space<vmem>>, vector<16x32xf32>
    %c0_1 = arith.constant 0 : index
    %c0_2 = arith.constant 0 : index
    %1 = vector.load %arg1[%c0_1, %c0_2] : memref<16x32xf32, #tpu.memory_space<vmem>>, vector<16x32xf32>
    %2 = arith.addf %0, %1 : vector<16x32xf32>
    %c0_3 = arith.constant 0 : index
    %c0_4 = arith.constant 0 : index
    %3 = vector.load %arg8[%c0_3, %c0_4] : memref<16x32xf32, #tpu.memory_space<vmem>>, vector<16x32xf32>
    tpu.vector_store %arg8[%c0_3, %c0_4], %2 {strides = array<i32>} : memref<16x32xf32, #tpu.memory_space<vmem>>, vector<16x32xf32>,
    %c7 = arith.constant 7 : index
    %c0_5 = arith.constant 0 : index
    %4 = vector.load %arg6[%c7, %c0_5] : memref<9x128xf32, #tpu.memory_space<vmem>>, vector<1x32xf32>
    %c8 = arith.constant 8 : index
    %c0_6 = arith.constant 0 : index
    %5 = vector.load %arg6[%c8, %c0_6] : memref<9x128xf32, #tpu.memory_space<vmem>>, vector<1x32xf32>
    %cst = arith.constant dense<0.000000e+00> : vector<16xf32>
    %6 = vector.multi_reduction <add>, %2, %cst [1] : vector<16x32xf32> to vector<16xf32>
    %7 = vector.shape_cast %6 : vector<16xf32> to vector<16x1xf32>
    %cst_7 = arith.constant 3.200000e+01 : f32
    %8 = vector.broadcast %cst_7 : f32 to vector<16x1xf32>
    %9 = arith.divf %7, %8 : vector<16x1xf32>
    %10 = vector.broadcast %9 : vector<16x1xf32> to vector<16x32xf32>
    %11 = arith.subf %2, %10 : vector<16x32xf32>
    %12 = arith.mulf %11, %11 : vector<16x32xf32>
    %cst_8 = arith.constant dense<0.000000e+00> : vector<16xf32>
    %13 = vector.multi_reduction <add>, %12, %cst_8 [1] : vector<16x32xf32> to vector<16xf32>
    %14 = vector.shape_cast %13 : vector<16xf32> to vector<16x1xf32>
    %cst_9 = arith.constant 3.200000e+01 : f32
    %15 = vector.broadcast %cst_9 : f32 to vector<16x1xf32>
    %16 = arith.divf %14, %15 : vector<16x1xf32>
    %cst_10 = arith.constant 9.99999974E-6 : f32
    %17 = vector.broadcast %cst_10 : f32 to vector<16x1xf32>
    %18 = arith.addf %16, %17 : vector<16x1xf32>
    %19 = math.rsqrt %18 : vector<16x1xf32>
    %20 = vector.broadcast %19 : vector<16x1xf32> to vector<16x32xf32>
    %21 = arith.mulf %11, %20 : vector<16x32xf32>
    %22 = vector.broadcast %4 : vector<1x32xf32> to vector<16x32xf32>
    %23 = arith.mulf %21, %22 : vector<16x32xf32>
    %24 = vector.broadcast %5 : vector<1x32xf32> to vector<16x32xf32>
    %25 = arith.addf %23, %24 : vector<16x32xf32>
    %26 = arith.truncf %25 : vector<16x32xf32> to vector<16x32xbf16>
    %c0_11 = arith.constant 0 : index
    %c0_12 = arith.constant 0 : index
    %27 = vector.load %arg2[%c0_11, %c0_12] : memref<32x128xbf16, #tpu.memory_space<vmem>>, vector<32x128xbf16>
    %cst_13 = arith.constant dense<0.000000e+00> : vector<16x128xf32>
    %28 = tpu.matmul %26, %27, %cst_13 {dimension_numbers = #tpu.dot_dimension_numbers<[1], [0], [0], [1], [0, 0, 1, 1], [], []>} : vector<16x32xbf16>, vector<32x128xbf16>, vector<16x128xf32> -> vector<16x128xf32>
    %29 = vector.extract_strided_slice %28 {offsets = [0, 0], sizes = [16, 64], strides = [1, 1]} : vector<16x128xf32> to vector<16x64xf32>
    %30 = vector.extract_strided_slice %28 {offsets = [0, 64], sizes = [16, 64], strides = [1, 1]} : vector<16x128xf32> to vector<16x64xf32>
    %31 = tpu.iota {dimensions = array<i32: 0>} : vector<16x1xi32>
    %c7_i32 = arith.constant 7 : i32
    %32 = vector.broadcast %c7_i32 : i32 to vector<16x1xi32>
    %33 = arith.andi %31, %32 : vector<16x1xi32>
    %cst_14 = arith.constant 0.000000e+00 : f32
    %34 = vector.broadcast %cst_14 : f32 to vector<3x64xf32>
    %35 = tpu.concatenate %34, %29 in 0 : vector<3x64xf32>, vector<16x64xf32> -> vector<19x64xf32>
    %c6 = arith.constant 6 : index
    %c0_15 = arith.constant 0 : index
    %36 = vector.load %arg6[%c6, %c0_15] : memref<9x128xf32, #tpu.memory_space<vmem>>, vector<1x64xf32>
    %37 = vector.broadcast %36 : vector<1x64xf32> to vector<16x64xf32>
    %38 = arith.mulf %29, %37 : vector<16x64xf32>
    %39 = vector.extract_strided_slice %35 {offsets = [0, 0], sizes = [16, 64], strides = [1, 1]} : vector<19x64xf32> to vector<16x64xf32>
    %c3 = arith.constant 3 : index
    %c0_16 = arith.constant 0 : index
    %40 = vector.load %arg6[%c3, %c0_16] : memref<9x128xf32, #tpu.memory_space<vmem>>, vector<1x64xf32>
    %41 = vector.broadcast %40 : vector<1x64xf32> to vector<16x64xf32>
    %42 = arith.mulf %39, %41 : vector<16x64xf32>
    %c3_i32 = arith.constant 3 : i32
    %43 = vector.broadcast %c3_i32 : i32 to vector<16x1xi32>
    %44 = arith.cmpi sge, %33, %43 : vector<16x1xi32>
    %cst_17 = arith.constant 0.000000e+00 : f32
    %45 = vector.shape_cast %44 : vector<16x1xi1> to vector<16x1xi1>
    %46 = vector.broadcast %45 : vector<16x1xi1> to vector<16x64xi1>
    %47 = vector.broadcast %cst_17 : f32 to vector<16x64xf32>
    %48 = arith.select %46, %42, %47 : vector<16x64xi1>, vector<16x64xf32>
    %49 = arith.addf %38, %48 : vector<16x64xf32>
    %50 = vector.extract_strided_slice %35 {offsets = [1, 0], sizes = [16, 64], strides = [1, 1]} : vector<19x64xf32> to vector<16x64xf32>
    %c4 = arith.constant 4 : index
    %c0_18 = arith.constant 0 : index
    %51 = vector.load %arg6[%c4, %c0_18] : memref<9x128xf32, #tpu.memory_space<vmem>>, vector<1x64xf32>
    %52 = vector.broadcast %51 : vector<1x64xf32> to vector<16x64xf32>
    %53 = arith.mulf %50, %52 : vector<16x64xf32>
    %c2_i32 = arith.constant 2 : i32
    %54 = vector.broadcast %c2_i32 : i32 to vector<16x1xi32>
    %55 = arith.cmpi sge, %33, %54 : vector<16x1xi32>
    %cst_19 = arith.constant 0.000000e+00 : f32
    %56 = vector.shape_cast %55 : vector<16x1xi1> to vector<16x1xi1>
    %57 = vector.broadcast %56 : vector<16x1xi1> to vector<16x64xi1>
    %58 = vector.broadcast %cst_19 : f32 to vector<16x64xf32>
    %59 = arith.select %57, %53, %58 : vector<16x64xi1>, vector<16x64xf32>
    %60 = arith.addf %49, %59 : vector<16x64xf32>
    %61 = vector.extract_strided_slice %35 {offsets = [2, 0], sizes = [16, 64], strides = [1, 1]} : vector<19x64xf32> to vector<16x64xf32>
    %c5 = arith.constant 5 : index
    %c0_20 = arith.constant 0 : index
    %62 = vector.load %arg6[%c5, %c0_20] : memref<9x128xf32, #tpu.memory_space<vmem>>, vector<1x64xf32>
    %63 = vector.broadcast %62 : vector<1x64xf32> to vector<16x64xf32>
    %64 = arith.mulf %61, %63 : vector<16x64xf32>
    %c1_i32 = arith.constant 1 : i32
    %65 = vector.broadcast %c1_i32 : i32 to vector<16x1xi32>
    %66 = arith.cmpi sge, %33, %65 : vector<16x1xi32>
    %cst_21 = arith.constant 0.000000e+00 : f32
    %67 = vector.shape_cast %66 : vector<16x1xi1> to vector<16x1xi1>
    %68 = vector.broadcast %67 : vector<16x1xi1> to vector<16x64xi1>
    %69 = vector.broadcast %cst_21 : f32 to vector<16x64xf32>
    %70 = arith.select %68, %64, %69 : vector<16x64xi1>, vector<16x64xf32>
    %71 = arith.addf %60, %70 : vector<16x64xf32>
    %c0_22 = arith.constant 0 : index
    %c0_23 = arith.constant 0 : index
    %72 = vector.load %arg6[%c0_22, %c0_23] : memref<9x128xf32, #tpu.memory_space<vmem>>, vector<1x64xf32>
    %73 = vector.broadcast %72 : vector<1x64xf32> to vector<16x64xf32>
    %74 = arith.addf %71, %73 : vector<16x64xf32>
    %75 = arith.negf %74 : vector<16x64xf32>
    %76 = math.exp %75 : vector<16x64xf32>
    %cst_24 = arith.constant 1.000000e+00 : f32
    %77 = vector.broadcast %cst_24 : f32 to vector<16x64xf32>
    %78 = arith.addf %77, %76 : vector<16x64xf32>
    %79 = arith.divf %77, %78 : vector<16x64xf32>
    %80 = arith.mulf %74, %79 : vector<16x64xf32>
    %81 = arith.truncf %80 : vector<16x64xf32> to vector<16x64xbf16>
    %c0_25 = arith.constant 0 : index
    %c0_26 = arith.constant 0 : index
    %82 = vector.load %arg3[%c0_25, %c0_26] : memref<64x96xbf16, #tpu.memory_space<vmem>>, vector<64x96xbf16>
    %cst_27 = arith.constant dense<0.000000e+00> : vector<16x96xf32>
    %83 = tpu.matmul %81, %82, %cst_27 {dimension_numbers = #tpu.dot_dimension_numbers<[1], [0], [0], [1], [0, 0, 1, 1], [], []>} : vector<16x64xbf16>, vector<64x96xbf16>, vector<16x96xf32> -> vector<16x96xf32>
    %84 = vector.extract_strided_slice %83 {offsets = [0, 0], sizes = [16, 64], strides = [1, 1]} : vector<16x96xf32> to vector<16x64xf32>
    %c1 = arith.constant 1 : index
    %c0_28 = arith.constant 0 : index
    %85 = vector.load %arg6[%c1, %c0_28] : memref<9x128xf32, #tpu.memory_space<vmem>>, vector<1x64xf32>
    %86 = vector.broadcast %85 : vector<1x64xf32> to vector<16x64xf32>
    %87 = arith.addf %84, %86 : vector<16x64xf32>
    %cst_29 = arith.constant 0.000000e+00 : f32
    %88 = vector.broadcast %cst_29 : f32 to vector<16x64xf32>
    %89 = arith.maximumf %87, %88 : vector<16x64xf32>
    %90 = vector.broadcast %cst_29 : f32 to vector<16x64xf32>
    %91 = arith.subf %87, %90 : vector<16x64xf32>
    %92 = arith.cmpf one, %91, %91 : vector<16x64xf32>
    %93 = vector.broadcast %cst_29 : f32 to vector<16x64xf32>
    %94 = arith.addf %87, %93 : vector<16x64xf32>
    %95 = math.absf %91 : vector<16x64xf32>
    %cst_30 = arith.constant 0.000000e+00 : f32
    %96 = vector.broadcast %cst_30 : f32 to vector<16x64xf32>
    %97 = arith.subf %96, %95 : vector<16x64xf32>
    %98 = math.exp %97 : vector<16x64xf32>
    %99 = math.log1p %98 : vector<16x64xf32>
    %100 = arith.addf %89, %99 : vector<16x64xf32>
    %101 = arith.select %92, %94, %100 : vector<16x64xi1>, vector<16x64xf32>
    %102 = vector.extract_strided_slice %83 {offsets = [0, 64], sizes = [16, 16], strides = [1, 1]} : vector<16x96xf32> to vector<16x16xf32>
    %103 = vector.extract_strided_slice %83 {offsets = [0, 80], sizes = [16, 16], strides = [1, 1]} : vector<16x96xf32> to vector<16x16xf32>
    %104 = vector.extract_strided_slice %101 {offsets = [0, 0], sizes = [8, 64], strides = [1, 1]} : vector<16x64xf32> to vector<8x64xf32>
    %105 = vector.extract_strided_slice %101 {offsets = [8, 0], sizes = [8, 64], strides = [1, 1]} : vector<16x64xf32> to vector<8x64xf32>
    %106 = tpu.concatenate %104, %105 in 1 : vector<8x64xf32>, vector<8x64xf32> -> vector<8x128xf32>
    %107 = vector.extract_strided_slice %80 {offsets = [0, 0], sizes = [8, 64], strides = [1, 1]} : vector<16x64xf32> to vector<8x64xf32>
    %108 = vector.extract_strided_slice %80 {offsets = [8, 0], sizes = [8, 64], strides = [1, 1]} : vector<16x64xf32> to vector<8x64xf32>
    %109 = tpu.concatenate %107, %108 in 1 : vector<8x64xf32>, vector<8x64xf32> -> vector<8x128xf32>
    %110 = arith.mulf %106, %109 : vector<8x128xf32>
    %111 = vector.shape_cast %106 : vector<8x128xf32> to vector<8x1x128xf32>
    %c0_31 = arith.constant 0 : index
    %c0_32 = arith.constant 0 : index
    %112 = vector.load %arg4[%c0_31, %c0_32] : memref<16x128xf32, #tpu.memory_space<vmem>>, vector<16x128xf32>
    %113 = vector.shape_cast %112 : vector<16x128xf32> to vector<1x16x128xf32>
    %114 = vector.broadcast %111 : vector<8x1x128xf32> to vector<8x16x128xf32>
    %115 = vector.broadcast %113 : vector<1x16x128xf32> to vector<8x16x128xf32>
    %116 = arith.mulf %114, %115 : vector<8x16x128xf32>
    %117 = math.exp %116 : vector<8x16x128xf32>
    %118 = vector.extract_strided_slice %110 {offsets = [0, 0], sizes = [8, 64], strides = [1, 1]} : vector<8x128xf32> to vector<8x64xf32>
    %119 = vector.shape_cast %118 : vector<8x64xf32> to vector<8x1x64xf32>
    %120 = vector.extract_strided_slice %102 {offsets = [0, 0], sizes = [8, 16], strides = [1, 1]} : vector<16x16xf32> to vector<8x16xf32>
    %121 = vector.shape_cast %120 : vector<8x16xf32> to vector<8x16x1xf32>
    %122 = vector.broadcast %119 : vector<8x1x64xf32> to vector<8x16x64xf32>
    %123 = vector.broadcast %121 : vector<8x16x1xf32> to vector<8x16x64xf32>
    %124 = arith.mulf %122, %123 : vector<8x16x64xf32>
    %125 = vector.extract_strided_slice %103 {offsets = [0, 0], sizes = [8, 16], strides = [1, 1]} : vector<16x16xf32> to vector<8x16xf32>
    %126 = vector.shape_cast %125 : vector<8x16xf32> to vector<8x16x1xf32>
    %127 = vector.shape_cast %126 : vector<8x16x1xf32> to vector<8x16x1xf32>
    %128 = vector.broadcast %127 : vector<8x16x1xf32> to vector<8x16x64xf32>
    %129 = vector.extract_strided_slice %110 {offsets = [0, 64], sizes = [8, 64], strides = [1, 1]} : vector<8x128xf32> to vector<8x64xf32>
    %130 = vector.shape_cast %129 : vector<8x64xf32> to vector<8x1x64xf32>
    %131 = vector.extract_strided_slice %102 {offsets = [8, 0], sizes = [8, 16], strides = [1, 1]} : vector<16x16xf32> to vector<8x16xf32>
    %132 = vector.shape_cast %131 : vector<8x16xf32> to vector<8x16x1xf32>
    %133 = vector.broadcast %130 : vector<8x1x64xf32> to vector<8x16x64xf32>
    %134 = vector.broadcast %132 : vector<8x16x1xf32> to vector<8x16x64xf32>
    %135 = arith.mulf %133, %134 : vector<8x16x64xf32>
    %136 = vector.extract_strided_slice %103 {offsets = [8, 0], sizes = [8, 16], strides = [1, 1]} : vector<16x16xf32> to vector<8x16xf32>
    %137 = vector.shape_cast %136 : vector<8x16xf32> to vector<8x16x1xf32>
    %138 = vector.shape_cast %137 : vector<8x16x1xf32> to vector<8x16x1xf32>
    %139 = vector.broadcast %138 : vector<8x16x1xf32> to vector<8x16x64xf32>
    %140 = tpu.concatenate %124, %135 in 2 : vector<8x16x64xf32>, vector<8x16x64xf32> -> vector<8x16x128xf32>
    %141 = tpu.concatenate %128, %139 in 2 : vector<8x16x64xf32>, vector<8x16x64xf32> -> vector<8x16x128xf32>
    %cst_33 = arith.constant 0.000000e+00 : f32
    %142 = vector.broadcast %cst_33 : f32 to vector<16x128xf32>
    %143 = vector.extract_strided_slice %117 {offsets = [0, 0, 0], sizes = [1, 16, 128], strides = [1, 1, 1]} : vector<8x16x128xf32> to vector<1x16x128xf32>
    %144 = vector.shape_cast %143 : vector<1x16x128xf32> to vector<16x128xf32>
    %145 = arith.mulf %144, %142 : vector<16x128xf32>
    %146 = vector.extract_strided_slice %140 {offsets = [0, 0, 0], sizes = [1, 16, 128], strides = [1, 1, 1]} : vector<8x16x128xf32> to vector<1x16x128xf32>
    %147 = vector.shape_cast %146 : vector<1x16x128xf32> to vector<16x128xf32>
    %148 = arith.addf %145, %147 : vector<16x128xf32>
    %149 = vector.extract_strided_slice %141 {offsets = [0, 0, 0], sizes = [1, 16, 128], strides = [1, 1, 1]} : vector<8x16x128xf32> to vector<1x16x128xf32>
    %150 = vector.shape_cast %149 : vector<1x16x128xf32> to vector<16x128xf32>
    %151 = arith.mulf %148, %150 : vector<16x128xf32>
    %cst_34 = arith.constant dense<0.000000e+00> : vector<128xf32>
    %152 = vector.multi_reduction <add>, %151, %cst_34 [0] : vector<16x128xf32> to vector<128xf32>
    %153 = vector.shape_cast %152 : vector<128xf32> to vector<1x128xf32>
    %154 = vector.extract_strided_slice %117 {offsets = [1, 0, 0], sizes = [1, 16, 128], strides = [1, 1, 1]} : vector<8x16x128xf32> to vector<1x16x128xf32>
    %155 = vector.shape_cast %154 : vector<1x16x128xf32> to vector<16x128xf32>
    %156 = arith.mulf %155, %148 : vector<16x128xf32>
    %157 = vector.extract_strided_slice %140 {offsets = [1, 0, 0], sizes = [1, 16, 128], strides = [1, 1, 1]} : vector<8x16x128xf32> to vector<1x16x128xf32>
    %158 = vector.shape_cast %157 : vector<1x16x128xf32> to vector<16x128xf32>
    %159 = arith.addf %156, %158 : vector<16x128xf32>
    %160 = vector.extract_strided_slice %141 {offsets = [1, 0, 0], sizes = [1, 16, 128], strides = [1, 1, 1]} : vector<8x16x128xf32> to vector<1x16x128xf32>
    %161 = vector.shape_cast %160 : vector<1x16x128xf32> to vector<16x128xf32>
    %162 = arith.mulf %159, %161 : vector<16x128xf32>
    %cst_35 = arith.constant dense<0.000000e+00> : vector<128xf32>
    %163 = vector.multi_reduction <add>, %162, %cst_35 [0] : vector<16x128xf32> to vector<128xf32>
    %164 = vector.shape_cast %163 : vector<128xf32> to vector<1x128xf32>
    %165 = vector.extract_strided_slice %117 {offsets = [2, 0, 0], sizes = [1, 16, 128], strides = [1, 1, 1]} : vector<8x16x128xf32> to vector<1x16x128xf32>
    %166 = vector.shape_cast %165 : vector<1x16x128xf32> to vector<16x128xf32>
    %167 = arith.mulf %166, %159 : vector<16x128xf32>
    %168 = vector.extract_strided_slice %140 {offsets = [2, 0, 0], sizes = [1, 16, 128], strides = [1, 1, 1]} : vector<8x16x128xf32> to vector<1x16x128xf32>
    %169 = vector.shape_cast %168 : vector<1x16x128xf32> to vector<16x128xf32>
    %170 = arith.addf %167, %169 : vector<16x128xf32>
    %171 = vector.extract_strided_slice %141 {offsets = [2, 0, 0], sizes = [1, 16, 128], strides = [1, 1, 1]} : vector<8x16x128xf32> to vector<1x16x128xf32>
    %172 = vector.shape_cast %171 : vector<1x16x128xf32> to vector<16x128xf32>
    %173 = arith.mulf %170, %172 : vector<16x128xf32>
    %cst_36 = arith.constant dense<0.000000e+00> : vector<128xf32>
    %174 = vector.multi_reduction <add>, %173, %cst_36 [0] : vector<16x128xf32> to vector<128xf32>
    %175 = vector.shape_cast %174 : vector<128xf32> to vector<1x128xf32>
    %176 = vector.extract_strided_slice %117 {offsets = [3, 0, 0], sizes = [1, 16, 128], strides = [1, 1, 1]} : vector<8x16x128xf32> to vector<1x16x128xf32>
    %177 = vector.shape_cast %176 : vector<1x16x128xf32> to vector<16x128xf32>
    %178 = arith.mulf %177, %170 : vector<16x128xf32>
    %179 = vector.extract_strided_slice %140 {offsets = [3, 0, 0], sizes = [1, 16, 128], strides = [1, 1, 1]} : vector<8x16x128xf32> to vector<1x16x128xf32>
    %180 = vector.shape_cast %179 : vector<1x16x128xf32> to vector<16x128xf32>
    %181 = arith.addf %178, %180 : vector<16x128xf32>
    %182 = vector.extract_strided_slice %141 {offsets = [3, 0, 0], sizes = [1, 16, 128], strides = [1, 1, 1]} : vector<8x16x128xf32> to vector<1x16x128xf32>
    %183 = vector.shape_cast %182 : vector<1x16x128xf32> to vector<16x128xf32>
    %184 = arith.mulf %181, %183 : vector<16x128xf32>
    %cst_37 = arith.constant dense<0.000000e+00> : vector<128xf32>
    %185 = vector.multi_reduction <add>, %184, %cst_37 [0] : vector<16x128xf32> to vector<128xf32>
    %186 = vector.shape_cast %185 : vector<128xf32> to vector<1x128xf32>
    %187 = vector.extract_strided_slice %117 {offsets = [4, 0, 0], sizes = [1, 16, 128], strides = [1, 1, 1]} : vector<8x16x128xf32> to vector<1x16x128xf32>
    %188 = vector.shape_cast %187 : vector<1x16x128xf32> to vector<16x128xf32>
    %189 = arith.mulf %188, %181 : vector<16x128xf32>
    %190 = vector.extract_strided_slice %140 {offsets = [4, 0, 0], sizes = [1, 16, 128], strides = [1, 1, 1]} : vector<8x16x128xf32> to vector<1x16x128xf32>
    %191 = vector.shape_cast %190 : vector<1x16x128xf32> to vector<16x128xf32>
    %192 = arith.addf %189, %191 : vector<16x128xf32>
    %193 = vector.extract_strided_slice %141 {offsets = [4, 0, 0], sizes = [1, 16, 128], strides = [1, 1, 1]} : vector<8x16x128xf32> to vector<1x16x128xf32>
    %194 = vector.shape_cast %193 : vector<1x16x128xf32> to vector<16x128xf32>
    %195 = arith.mulf %192, %194 : vector<16x128xf32>
    %cst_38 = arith.constant dense<0.000000e+00> : vector<128xf32>
    %196 = vector.multi_reduction <add>, %195, %cst_38 [0] : vector<16x128xf32> to vector<128xf32>
    %197 = vector.shape_cast %196 : vector<128xf32> to vector<1x128xf32>
    %198 = vector.extract_strided_slice %117 {offsets = [5, 0, 0], sizes = [1, 16, 128], strides = [1, 1, 1]} : vector<8x16x128xf32> to vector<1x16x128xf32>
    %199 = vector.shape_cast %198 : vector<1x16x128xf32> to vector<16x128xf32>
    %200 = arith.mulf %199, %192 : vector<16x128xf32>
    %201 = vector.extract_strided_slice %140 {offsets = [5, 0, 0], sizes = [1, 16, 128], strides = [1, 1, 1]} : vector<8x16x128xf32> to vector<1x16x128xf32>
    %202 = vector.shape_cast %201 : vector<1x16x128xf32> to vector<16x128xf32>
    %203 = arith.addf %200, %202 : vector<16x128xf32>
    %204 = vector.extract_strided_slice %141 {offsets = [5, 0, 0], sizes = [1, 16, 128], strides = [1, 1, 1]} : vector<8x16x128xf32> to vector<1x16x128xf32>
    %205 = vector.shape_cast %204 : vector<1x16x128xf32> to vector<16x128xf32>
    %206 = arith.mulf %203, %205 : vector<16x128xf32>
    %cst_39 = arith.constant dense<0.000000e+00> : vector<128xf32>
    %207 = vector.multi_reduction <add>, %206, %cst_39 [0] : vector<16x128xf32> to vector<128xf32>
    %208 = vector.shape_cast %207 : vector<128xf32> to vector<1x128xf32>
    %209 = vector.extract_strided_slice %117 {offsets = [6, 0, 0], sizes = [1, 16, 128], strides = [1, 1, 1]} : vector<8x16x128xf32> to vector<1x16x128xf32>
    %210 = vector.shape_cast %209 : vector<1x16x128xf32> to vector<16x128xf32>
    %211 = arith.mulf %210, %203 : vector<16x128xf32>
    %212 = vector.extract_strided_slice %140 {offsets = [6, 0, 0], sizes = [1, 16, 128], strides = [1, 1, 1]} : vector<8x16x128xf32> to vector<1x16x128xf32>
    %213 = vector.shape_cast %212 : vector<1x16x128xf32> to vector<16x128xf32>
    %214 = arith.addf %211, %213 : vector<16x128xf32>
    %215 = vector.extract_strided_slice %141 {offsets = [6, 0, 0], sizes = [1, 16, 128], strides = [1, 1, 1]} : vector<8x16x128xf32> to vector<1x16x128xf32>
    %216 = vector.shape_cast %215 : vector<1x16x128xf32> to vector<16x128xf32>
    %217 = arith.mulf %214, %216 : vector<16x128xf32>
    %cst_40 = arith.constant dense<0.000000e+00> : vector<128xf32>
    %218 = vector.multi_reduction <add>, %217, %cst_40 [0] : vector<16x128xf32> to vector<128xf32>
    %219 = vector.shape_cast %218 : vector<128xf32> to vector<1x128xf32>
    %220 = vector.extract_strided_slice %117 {offsets = [7, 0, 0], sizes = [1, 16, 128], strides = [1, 1, 1]} : vector<8x16x128xf32> to vector<1x16x128xf32>
    %221 = vector.shape_cast %220 : vector<1x16x128xf32> to vector<16x128xf32>
    %222 = arith.mulf %221, %214 : vector<16x128xf32>
    %223 = vector.extract_strided_slice %140 {offsets = [7, 0, 0], sizes = [1, 16, 128], strides = [1, 1, 1]} : vector<8x16x128xf32> to vector<1x16x128xf32>
    %224 = vector.shape_cast %223 : vector<1x16x128xf32> to vector<16x128xf32>
    %225 = arith.addf %222, %224 : vector<16x128xf32>
    %226 = vector.extract_strided_slice %141 {offsets = [7, 0, 0], sizes = [1, 16, 128], strides = [1, 1, 1]} : vector<8x16x128xf32> to vector<1x16x128xf32>
    %227 = vector.shape_cast %226 : vector<1x16x128xf32> to vector<16x128xf32>
    %228 = arith.mulf %225, %227 : vector<16x128xf32>
    %cst_41 = arith.constant dense<0.000000e+00> : vector<128xf32>
    %229 = vector.multi_reduction <add>, %228, %cst_41 [0] : vector<16x128xf32> to vector<128xf32>
    %230 = vector.shape_cast %229 : vector<128xf32> to vector<1x128xf32>
    %231 = tpu.concatenate %153, %164, %175, %186, %197, %208, %219, %230 in 0 : vector<1x128xf32>, vector<1x128xf32>, vector<1x128xf32>, vector<1x128xf32>, vector<1x128xf32>, vector<1x128xf32>, vector<1x128xf32>, vector<1x128xf32> -> vector<8x128xf32>
    %c2 = arith.constant 2 : index
    %c0_42 = arith.constant 0 : index
    %232 = vector.load %arg6[%c2, %c0_42] : memref<9x128xf32, #tpu.memory_space<vmem>>, vector<1x128xf32>
    %233 = vector.broadcast %232 : vector<1x128xf32> to vector<8x128xf32>
    %234 = arith.mulf %109, %233 : vector<8x128xf32>
    %235 = arith.addf %231, %234 : vector<8x128xf32>
    %236 = vector.extract_strided_slice %235 {offsets = [0, 0], sizes = [8, 64], strides = [1, 1]} : vector<8x128xf32> to vector<8x64xf32>
    %237 = vector.extract_strided_slice %235 {offsets = [0, 64], sizes = [8, 64], strides = [1, 1]} : vector<8x128xf32> to vector<8x64xf32>
    %238 = tpu.concatenate %236, %237 in 0 : vector<8x64xf32>, vector<8x64xf32> -> vector<16x64xf32>
    %239 = arith.negf %30 : vector<16x64xf32>
    %240 = math.exp %239 : vector<16x64xf32>
    %cst_43 = arith.constant 1.000000e+00 : f32
    %241 = vector.broadcast %cst_43 : f32 to vector<16x64xf32>
    %242 = arith.addf %241, %240 : vector<16x64xf32>
    %243 = arith.divf %241, %242 : vector<16x64xf32>
    %244 = arith.mulf %30, %243 : vector<16x64xf32>
    %245 = arith.mulf %238, %244 : vector<16x64xf32>
    %246 = arith.truncf %245 : vector<16x64xf32> to vector<16x64xbf16>
    %c0_44 = arith.constant 0 : index
    %c0_45 = arith.constant 0 : index
    %247 = vector.load %arg5[%c0_44, %c0_45] : memref<64x32xbf16, #tpu.memory_space<vmem>>, vector<64x32xbf16>
    %cst_46 = arith.constant dense<0.000000e+00> : vector<16x32xf32>
    %248 = tpu.matmul %246, %247, %cst_46 {dimension_numbers = #tpu.dot_dimension_numbers<[1], [0], [0], [1], [0, 0, 1, 1], [], []>} : vector<16x64xbf16>, vector<64x32xbf16>, vector<16x32xf32> -> vector<16x32xf32>
    %c0_47 = arith.constant 0 : index
    %c0_48 = arith.constant 0 : index
    %249 = vector.load %arg7[%c0_47, %c0_48] : memref<16x32xf32, #tpu.memory_space<vmem>>, vector<16x32xf32>
    tpu.vector_store %arg7[%c0_47, %c0_48], %248 {strides = array<i32>} : memref<16x32xf32, #tpu.memory_space<vmem>>, vector<16x32xf32>,
    return
  }
}

</mosaic_0001>

<bundles_post_ra>
// kernel: block_forward.1
= control target key start
LH: loop header
LB: loop body
LE: loop exit
PB: predicated region body
PF: predicated region fallthrough
CT: control target
= control target key end

     0   :  { %14 = vsyncpa [#allocation3], 0  ;;  %s2242_s0 = inlined_call_operand.vmem [shape: f32[16,32], index: 0, kind: input, shape index: {}]   ;;  %s2243_s1 = inlined_call_operand.hbm [shape: f32[16,32], index: 1, kind: input, shape index: {}]   ;;  %s2244_s2 = inlined_call_operand.hbm [shape: bf16[32,128], index: 2, kind: input, shape index: {}]   ;;  %s2245_s3 = inlined_call_operand.vmem [shape: bf16[64,96], index: 3, kind: input, shape index: {}]   ;;  %s2246_s4 = inlined_call_operand.hbm [shape: f32[16,128], index: 4, kind: input, shape index: {}]   ;;  %s2247_s5 = inlined_call_operand.vmem [shape: bf16[64,32], index: 5, kind: input, shape index: {}]   ;;  %s2248_s6 = inlined_call_operand.hbm [shape: f32[9,128], index: 6, kind: input, shape index: {}]   ;;  %s2249_s7 = inlined_call_operand.hbm [shape: f32[16,32], index: 7, kind: output, shape index: {0}]   ;;  %s2250_s8 = inlined_call_operand.hbm [shape: f32[16,32], index: 8, kind: output, shape index: {1}]  }
   0x1   :  { %15 = vsyncpa [#allocation6], 0 }
   0x2   :  { %16 = vsyncpa [#allocation9], 0 }
   0x3   :  { %17 = vsyncpa [#allocation4], 0 }
   0x4   :  { %18 = vsyncpa [#allocation12], 0  ;;  %s1621_s27 = smov [#allocation5]   ;;  %s1479_s9 = scalar_lea.hbm %s2244_s2, 256 }
   0x5   :  { %s38_s28 = sshll.u32 %s1621_s27, 4  ;;  %p1480_p0 = scmp.ne.s32.totalorder %s2244_s2, %s1479_s9  ;;  %s39_s28 = int_to_ptr.vmem [resolvable:$true] %s38_s28 }
   0x6   :  { %p1483_p1 = scmp.lt.u32.totalorder %s1479_s9, %s2244_s2 }
   0x8   :  { %p1485_p2 = pnand %p1483_p1, %p1480_p0 }
   0xa   :  { %1488 = shalt.err (!%p1485_p2)
}
   0xb   :  { %s1489_s14 = scalar_lea.vmem %s39_s28, 256  ;;  %p1494_p4 = scmp.lt.s32.totalorder %s39_s28, %s39_s28 }
   0xc   :  { %p1490_p3 = scmp.ne.s32.totalorder %s39_s28, %s1489_s14  ;;  %p1495_p5 = scmp.lt.s32.totalorder %s1489_s14, %s1489_s14 }
   0xe   :  { %p1496_p6 = por %p1495_p5, %p1494_p4 }
  0x10   :  { %p1497_p7 = pnand %p1496_p6, %p1490_p3 }
  0x12   :  { %1500 = shalt.err (!%p1497_p7)
}
  0x13   :  { %s1622_s15 = smov 64   ;;  %s1623_s16 = smov 4  }
  0x14   :  { %44 = dma.hbm_to_vmem [thread:$0]  %s2244_s2, 256, %s39_s28, [#allocation6], %s1622_s15, %s1622_s15, %s1623_s16  }
  0x15   :  { %s1624_s19 = smov [#allocation2]   ;;  %s1501_s23 = scalar_lea.hbm %s2243_s1, 256 }
  0x16   :  { %s26_s20 = sshll.u32 %s1624_s19, 4  ;;  %p1502_p8 = scmp.ne.s32.totalorder %s2243_s1, %s1501_s23  ;;  %s27_s20 = int_to_ptr.vmem [resolvable:$true] %s26_s20 }
  0x17   :  { %p1505_p9 = scmp.lt.u32.totalorder %s1501_s23, %s2243_s1 }
  0x19   :  { %p1507_p10 = pnand %p1505_p9, %p1502_p8 }
  0x1b   :  { %1510 = shalt.err (!%p1507_p10)
}
  0x1c   :  { %s1511_s29 = scalar_lea.vmem %s27_s20, 256  ;;  %p1516_p12 = scmp.lt.s32.totalorder %s27_s20, %s27_s20 }
  0x1d   :  { %p1512_p11 = scmp.ne.s32.totalorder %s27_s20, %s1511_s29  ;;  %p1517_p13 = scmp.lt.s32.totalorder %s1511_s29, %s1511_s29 }
  0x1f   :  { %p1518_p0 = por %p1517_p13, %p1516_p12 }
  0x21   :  { %p1519_p1 = pnand %p1518_p0, %p1512_p11 }
  0x23   :  { %1522 = shalt.err (!%p1519_p1)
}
  0x24   :  { %s1625_s2 = smov 128   ;;  %s1626_s28 = smov 8  }
  0x25   :  { %32 = dma.hbm_to_vmem [thread:$0]  %s2243_s1, 256, %s27_s20, [#allocation3], %s1625_s2, %s1625_s2, %s1626_s28  }
  0x26   :  { %s1627_s10 = smov [#allocation7]   ;;  %s1628_s12 = smov [#allocation8]  }
  0x27   :  { %s52_s11 = sshll.u32 %s1627_s10, 4  ;;  %s66_s13 = sshll.u32 %s1628_s12, 4  ;;  %s53_s11 = int_to_ptr.vmem [resolvable:$true] %s52_s11  ;;  %s1708_s13 = int_to_ptr.vmem [resolvable:$true] %s66_s13 }
  0x28   :  { %s1523_s17 = scalar_lea.hbm %s2246_s4, 256 }
  0x29   :  { %p1524_p2 = scmp.ne.s32.totalorder %s2246_s4, %s1523_s17  ;;  %p1527_p3 = scmp.lt.u32.totalorder %s1523_s17, %s2246_s4 }
  0x2b   :  { %p1529_p4 = pnand %p1527_p3, %p1524_p2 }
  0x2d   :  { %1532 = shalt.err (!%p1529_p4)
}
  0x2e   :  { %s1533_s1 = scalar_lea.vmem %s53_s11, 256  ;;  %p1538_p6 = scmp.lt.s32.totalorder %s53_s11, %s53_s11 }
  0x2f   :  { %p1534_p5 = scmp.ne.s32.totalorder %s53_s11, %s1533_s1  ;;  %p1539_p7 = scmp.lt.s32.totalorder %s1533_s1, %s1533_s1 }
  0x31   :  { %p1540_p8 = por %p1539_p7, %p1538_p6 }
  0x33   :  { %p1541_p9 = pnand %p1540_p8, %p1534_p5 }
  0x35   :  { %1544 = shalt.err (!%p1541_p9)
}
  0x36   :  { %58 = dma.hbm_to_vmem [thread:$0]  %s2246_s4, 256, %s53_s11, [#allocation6], %s1625_s2, %s1625_s2, %s1626_s28  }
  0x37   :  { %s1545_s26 = scalar_lea.hbm %s2248_s6, 256 }
  0x38   :  { %p1546_p10 = scmp.ne.s32.totalorder %s2248_s6, %s1545_s26  ;;  %p1549_p11 = scmp.lt.u32.totalorder %s1545_s26, %s2248_s6 }
  0x3a   :  { %p1551_p12 = pnand %p1549_p11, %p1546_p10 }
  0x3c   :  { %1554 = shalt.err (!%p1551_p12)
}
  0x3d   :  { %s1555_s10 = scalar_lea.vmem %s1708_s13, 256  ;;  %p1560_p0 = scmp.lt.s32.totalorder %s1708_s13, %s1708_s13 }
  0x3e   :  { %p1556_p13 = scmp.ne.s32.totalorder %s1708_s13, %s1555_s10  ;;  %p1561_p1 = scmp.lt.s32.totalorder %s1555_s10, %s1555_s10 }
  0x40   :  { %p1562_p2 = por %p1561_p1, %p1560_p0 }
  0x42   :  { %p1563_p3 = pnand %p1562_p2, %p1556_p13 }
  0x44   :  { %1566 = shalt.err (!%p1563_p3)
}
  0x45   :  { %72 = dma.hbm_to_vmem [thread:$0]  %s2248_s6, 256, %s1708_s13, [#allocation9], %s1625_s2, %s1625_s2, %s1626_s28  }
  0x46   :  { %1611 = dma.done.wait [#allocation3], 256  }
  0x47   :  { %1612 = vsyncadd [#allocation3], 4294967040 }
  0x48   :  { %1613 = dma.done.wait [#allocation6], 512  }
  0x49   :  { %1614 = vsyncadd [#allocation6], 4294966784 }
  0x4a   :  { %1615 = dma.done.wait [#allocation9], 256  }
  0x4b   :  { %1616 = vsyncadd [#allocation9], 4294967040  ;;  %v86_v0 = vld [vmem:[%s2242_s0] sm:$0xff]  ;;  %vm92_vm0 = vcmask 261120   ;;  %v87_v2 = vld [vmem:[%s2242_s0 + $0x8] sm:$0xff]  ;;  %v2251_v19 = vmov 0.0   ;;  %v197_v42 = vlaneseq }
  0x4c   :  { %v88_v1 = vld [vmem:[#allocation2] sm:$0xff]  ;;  %v89_v4 = vld [vmem:[#allocation2 + $0x8] sm:$0xff]  ;;  %v1409_v18 = vld [vmem:[#allocation5] sm:$0xff]   ;;  %1364 = vmatprep.subr.bf16.mxu0 %v2251_v19  ;;  %1372 = vmatprep.subr.bf16.mxu1 %v2251_v19  ;;  %vm1630_vm1 = vmmov 0   ;;  %vm204_vm2 = vcmask 1042432   ;;  %vm253_vm5 = vcmask 1046528  }
  0x4d   :  { %v90_v3 = vadd.f32 %v88_v1, %v86_v0  ;;  %v91_v5 = vadd.f32 %v89_v4, %v87_v2  ;;  %1365 = vmatpush3.bf16.msra.mxu0 %v1409_v18  ;;  %v1410_v20 = vld [vmem:[#allocation5 + $0x8] sm:$0xff]   ;;  %1368 = vmatprep.mubr.msk.bf16.mxu0 %vm1630_vm1, %v2251_v19  ;;  %v1325_v29 = vld [vmem:[#allocation8 + $0x7] ss:$0 sm:$0xff]  ;;  %v1411_v38 = vld [vmem:[%s2245_s3] sm:$0xff]   ;;  %v1783_v43 = vshrl.u32 %v197_v42, 7  ;;  %vm282_vm7 = vcmask 1045504  }
  0x4e   :  { %1366 = vmatprep.subr.bf16.mxu0 %v2251_v19  ;;  %1380 = vmatprep.mubr.msk.bf16.mxu1 %vm1630_vm1, %v2251_v19  ;;  %v1326_v33 = vld [vmem:[#allocation8 + $0x8] ss:$0 sm:$0xff]  ;;  %v1412_v39 = vld [vmem:[%s2245_s3 + $0x8] sm:$0xff]   ;;  %v1413_v40 = vld [vmem:[%s2245_s3 + $0x10] sm:$0xff]   ;;  %vm348_vm11 = vcmask 523264  }
  0x4f   :  { %v97_v6 = vsel %vm92_vm0, %v90_v3, 0.0  ;;  %93 = vst.msk [vmem:[#allocation11] sm:$0xff] %vm92_vm0, %v90_v3  ;;  %v100_v7 = vsel %vm92_vm0, %v91_v5, 0.0  ;;  %94 = vst.msk [vmem:[#allocation11 + $0x8] sm:$0xff] %vm92_vm0, %v91_v5  ;;  %1373 = vmatpush3.bf16.msra.mxu1 %v1411_v38  ;;  %v1414_v41 = vld [vmem:[%s2245_s3 + $0x18] sm:$0xff]   ;;  %v199_v44 = vadd.s32 8, %v1783_v43 }
  0x50   :  { %98 = vadd.xlane.f32.xlu0 %v97_v6  ;;  %1374 = vmatprep.subr.bf16.mxu1 %v2251_v19  ;;  %v200_v46 = vand.u32 7, %v1783_v43  ;;  %v1331_v49 = vld [vmem:[#allocation8 + $0x3] ss:$0 sm:$0xff]  ;;  %v1332_v51 = vld [vmem:[#allocation8 + $0x4] ss:$0 sm:$0xff]  ;;  %v1811_v42 = vsub.s32 0, %v1783_v43 }
  0x51   :  { %1367 = vmatpush3.bf16.msra.mxu0 %v1410_v20  ;;  %v201_v47 = vand.u32 7, %v199_v44  ;;  %v1333_v52 = vld [vmem:[#allocation8 + $0x5] ss:$0 sm:$0xff]  ;;  %v1330_v62 = vld [vmem:[#allocation8 + $0x6] ss:$0 sm:$0xff]  ;;  %v651_v44 = vsub.s32 1, %v1783_v43 }
  0x52   :  { %1384 = vmatprep.subr.bf16.mxu0 %v2251_v19  ;;  %vm226_vm3 = vcmp.ge.s32.totalorder %v200_v46, 3  ;;  %vm244_vm6 = vcmp.ge.s32.totalorder %v200_v46, 2  ;;  %vm273_vm9 = vcmp.ge.s32.totalorder %v200_v46, 1  ;;  %v1342_v46 = vld [vmem:[#allocation8 + $0x1] ss:$0 sm:$0xff] }
  0x53   :  { %1375 = vmatpush3.bf16.msra.mxu1 %v1412_v39  ;;  %vm227_vm4 = vcmp.ge.s32.totalorder %v201_v47, 3  ;;  %vm245_vm8 = vcmp.ge.s32.totalorder %v201_v47, 2  ;;  %vm274_vm10 = vcmp.ge.s32.totalorder %v201_v47, 1 }
  0x54   :  { %101 = vadd.xlane.f32.xlu0 %v100_v7  ;;  %1376 = vmatprep.subr.bf16.mxu1 %v2251_v19 }
  0x57   :  { %1377 = vmatpush3.bf16.msra.mxu1 %v1413_v40 }
  0x58   :  { %1378 = vmatprep.subr.bf16.mxu1 %v2251_v19 }
  0x5b   :  { %1379 = vmatpush3.bf16.msra.mxu1 %v1414_v41 }
  0xdd   :  { %v99_v8 = vpop.xlane.xlu0 %98 }
  0xde   :  { %v104_v9 = vmul.f32 0.03125, %v99_v8 }
  0xe0   :  { %v106_v10 = vsub.f32 %v90_v3, %v104_v9 }
  0xe1   :  { %v102_v11 = vpop.xlane.xlu0 %101 }
  0xe2   :  { %v105_v12 = vmul.f32 0.03125, %v102_v11  ;;  %v108_v13 = vmul.f32 %v106_v10, %v106_v10 }
  0xe4   :  { %v107_v14 = vsub.f32 %v91_v5, %v105_v12  ;;  %v110_v15 = vsel %vm92_vm0, %v108_v13, 0.0 }
  0xe5   :  { %111 = vadd.xlane.f32.xlu1 %v110_v15 }
  0xe6   :  { %v109_v16 = vmul.f32 %v107_v14, %v107_v14 }
  0xe8   :  { %v113_v17 = vsel %vm92_vm0, %v109_v16, 0.0 }
  0xe9   :  { %114 = vadd.xlane.f32.xlu1 %v113_v17 }
 0x172   :  { %v112_v21 = vpop.xlane.xlu1 %111 }
 0x173   :  { %v116_v22 = vmul.f32 0.03125, %v112_v21 }
 0x175   :  { %v118_v23 = vadd.f32 1e-05, %v116_v22 }
 0x176   :  { %v115_v24 = vpop.xlane.xlu1 %114 }
 0x177   :  { %1419 = vrsqrt.f32 %v118_v23  ;;  %v117_v25 = vmul.f32 0.03125, %v115_v24 }
 0x179   :  { %v119_v26 = vadd.f32 1e-05, %v117_v25 }
 0x17b   :  { %1421 = vrsqrt.f32 %v119_v26  ;;  %v1334_v26 = vld [vmem:[#allocation8] ss:$0 sm:$0xff] }
 0x181   :  { %v1420_v27 = vpop.eup %1419 }
 0x182   :  { %v122_v28 = vmul.f32 %v1420_v27, %v106_v10 }
 0x184   :  { %v128_v32 = vmul.f32 %v1325_v29, %v122_v28 }
 0x185   :  { %v1422_v30 = vpop.eup %1421 }
 0x186   :  { %v123_v31 = vmul.f32 %v1422_v30, %v107_v14  ;;  %v134_v35 = vadd.f32 %v1326_v33, %v128_v32 }
 0x188   :  { %v129_v34 = vmul.f32 %v1325_v29, %v123_v31 }
 0x18a   :  { %v135_v36 = vadd.f32 %v1326_v33, %v129_v34 }
 0x18c   :  { %v136_v37 = vpack.c.bf16 %v135_v36, %v134_v35 }
 0x18e   :  { %1369 = vmatmul.mubr.msk.bf16.vlgmr.msra.gmra.mrb[0].mxu0 %vm92_vm0, %v136_v37 }
 0x18f   :  { %1392 = vmatprep.mubr.msk.bf16.mxu0 %vm1630_vm1, %v2251_v19  ;;  %vm1165_vm1 = vcmask 1040384  }
 0x261   :  { %v1786_v45 = vpop.f32.mrb[0].mxu0 }
 0x262   :  { %v205_v48 = vrot.slane %v1786_v45, 5  ;;  %v1370_v50 = vpop.f32.mrb[1].mxu0  ;;  %v217_v8 = vmul.f32 %v1330_v62, %v1786_v45 }
 0x263   :  { %v1790_v53 = vpop.f32.mrb[2].mxu0 }
 0x264   :  { %2254 = vst [vmem:[#allocation18_spill] sm:$0xff] %v1790_v53  ;;  %v211_v54 = vsel %vm204_vm2, 0.0, %v205_v48  ;;  %v206_v55 = vrot.slane %v1790_v53, 5  ;;  %v1371_v56 = vpop.f32.mrb[3].mxu0  ;;  %v218_v1 = vmul.f32 %v1330_v62, %v1790_v53 }
 0x265   :  { %v224_v57 = vmul.f32 %v1331_v49, %v211_v54  ;;  %v241_v58 = vmul.f32 %v1332_v51, %v211_v54  ;;  %v270_v63 = vmul.f32 %v1333_v52, %v211_v54 }
 0x266   :  { %v207_v59 = vsel %vm204_vm2, %v205_v48, %v206_v55  ;;  %v243_v60 = vmul.f32 %v1332_v51, %v206_v55  ;;  %v272_v61 = vmul.f32 %v1333_v52, %v206_v55 }
 0x267   :  { %v225_v0 = vmul.f32 %v1331_v49, %v207_v59  ;;  %v242_v2 = vmul.f32 %v1332_v51, %v207_v59  ;;  %v232_v4 = vsel %vm226_vm3, %v224_v57, 0.0  ;;  %v271_v7 = vmul.f32 %v1333_v52, %v207_v59 }
 0x268   :  { %v257_v3 = vrot.slane %v243_v60, 1  ;;  %v286_v6 = vrot.slane %v272_v61, 2  ;;  %v254_v9 = vrot.slane %v241_v58, 1  ;;  %v283_v12 = vrot.slane %v270_v63, 2 }
 0x269   :  { %v233_v5 = vsel %vm227_vm4, %v225_v0, 0.0  ;;  %v255_v11 = vrot.slane %v242_v2, 1  ;;  %v284_v13 = vrot.slane %v271_v7, 2  ;;  %v234_v14 = vadd.f32 %v232_v4, %v217_v8 }
 0x26a   :  { %v235_v10 = vadd.f32 %v233_v5, %v218_v1  ;;  %v663_v51 = vsub.s32 2, %v1783_v43  ;;  %v675_v57 = vsub.s32 3, %v1783_v43  ;;  %v687_v59 = vsub.s32 4, %v1783_v43 }
 0x26b   :  { %v256_v15 = vsel %vm253_vm5, %v254_v9, %v255_v11  ;;  %v258_v16 = vsel %vm253_vm5, %v255_v11, %v257_v3  ;;  %v285_v20 = vsel %vm282_vm7, %v283_v12, %v284_v13  ;;  %v287_v21 = vsel %vm282_vm7, %v284_v13, %v286_v6 }
 0x26c   :  { %v261_v17 = vsel %vm244_vm6, %v256_v15, 0.0  ;;  %v262_v18 = vsel %vm245_vm8, %v258_v16, 0.0  ;;  %v290_v24 = vsel %vm273_vm9, %v285_v20, 0.0  ;;  %v291_v25 = vsel %vm274_vm10, %v287_v21, 0.0 }
 0x26d   :  { %v263_v22 = vadd.f32 %v261_v17, %v234_v14  ;;  %v264_v23 = vadd.f32 %v262_v18, %v235_v10  ;;  %v699_v61 = vsub.s32 5, %v1783_v43  ;;  %v711_v0 = vsub.s32 6, %v1783_v43 }
 0x26e   :  { %vm1167_vm3 = vcmask 1041408   ;;  %vm1170_vm4 = vcmask 1043456  }
 0x26f   :  { %v292_v27 = vadd.f32 %v290_v24, %v263_v22  ;;  %v293_v28 = vadd.f32 %v291_v25, %v264_v23  ;;  %v723_v25 = vsub.s32 7, %v1783_v43 }
 0x271   :  { %v299_v29 = vadd.f32 %v1334_v26, %v292_v27  ;;  %v300_v30 = vadd.f32 %v1334_v26, %v293_v28  ;;  %v1344_v28 = vmul.f32 -1.442695, %v1786_v45 }
 0x273   :  { %v1335_v31 = vmul.f32 -1.442695, %v299_v29  ;;  %v1336_v32 = vmul.f32 -1.442695, %v300_v30 }
 0x275   :  { %1423 = vpow2.f32 %v1335_v31 }
 0x276   :  { %1425 = vpow2.f32 %v1336_v32 }
 0x27f   :  { %v1424_v33 = vpop.eup %1423 }
 0x280   :  { %v1426_v34 = vpop.eup %1425  ;;  %v307_v35 = vadd.f32 1.0, %v1424_v33 }
 0x281   :  { %v308_v36 = vadd.f32 1.0, %v1426_v34 }
 0x282   :  { %1427 = vrcp.f32 %v307_v35 }
 0x283   :  { %1429 = vrcp.f32 %v308_v36 }
 0x28c   :  { %v1428_v37 = vpop.eup %1427 }
 0x28d   :  { %v1430_v38 = vpop.eup %1429  ;;  %v1805_v39 = vmul.f32 %v1428_v37, %v299_v29 }
 0x28e   :  { %v314_v40 = vmul.f32 %v1430_v38, %v300_v30 }
 0x290   :  { %442 = vrot.lane.b32.xlu1 %v314_v40, %s1622_s15  ;;  %v315_v41 = vpack.c.bf16 %v314_v40, %v1805_v39 }
 0x292   :  { %1381 = vmatmul.mubr.msk.bf16.vlgmr.msra.gmra.mrb[0].mxu1 %vm348_vm11, %v315_v41 }
 0x302   :  { %v1876_v30 = vpop.permute.xlu1 %442 }
 0x365   :  { %v1814_v47 = vpop.f32.mrb[0].mxu1 }
 0x366   :  { %v1382_v48 = vpop.f32.mrb[1].mxu1  ;;  %v652_v49 = vrot.slane %v1814_v47, %v651_v44  ;;  %v640_v50 = vrot.slane %v1814_v47, %v1811_v42  ;;  %v1823_v54 = vadd.f32 %v1342_v46, %v1814_v47  ;;  %v1826_v56 = vrot.slane %v1814_v47, %v663_v51 }
 0x367   :  { %v1820_v52 = vpop.f32.mrb[2].mxu1  ;;  %v1831_v58 = vrot.slane %v1814_v47, %v675_v57  ;;  %v1836_v60 = vrot.slane %v1814_v47, %v687_v59  ;;  %v1843_v63 = vrot.slane %v1814_v47, %v699_v61  ;;  %v1849_v2 = vrot.slane %v1814_v47, %v711_v0 }
 0x368   :  { %655 = vbcast.lane.b32.xlu0 %v652_v49, 320  ;;  %643 = vbcast.lane.b32.xlu1 %v640_v50, 320  ;;  %v1383_v55 = vpop.f32.mrb[3].mxu1  ;;  %v399_v62 = vadd.f32 %v1342_v46, %v1820_v52  ;;  %v856_v5 = vrot.slane %v1820_v52, %v1811_v42  ;;  %v868_v6 = vrot.slane %v1820_v52, %v651_v44  ;;  %v406_v44 = vand.u32 2147483647, %v1823_v54 }
 0x369   :  { %v880_v8 = vrot.slane %v1820_v52, %v663_v51  ;;  %v892_v10 = vrot.slane %v1820_v52, %v675_v57  ;;  %v904_v11 = vrot.slane %v1820_v52, %v687_v59  ;;  %v916_v12 = vrot.slane %v1820_v52, %v699_v61  ;;  %v1416_v59 = vld [vmem:[%s2247_s5 + $0x8] sm:$0xff]  }
 0x36a   :  { %v407_v1 = vand.u32 2147483647, %v399_v62  ;;  %v928_v15 = vrot.slane %v1820_v52, %v711_v0  ;;  %v401_v22 = vmax.f32 %v399_v62, 0.0  ;;  %vm403_vm13 = vcmp.ne.f32.partialorder %v399_v62, %v399_v62 }
 0x36b   :  { %v724_v26 = vrot.slane %v1814_v47, %v723_v25  ;;  %v940_v27 = vrot.slane %v1820_v52, %v723_v25  ;;  %vm402_vm15 = vcmp.ne.f32.partialorder %v1823_v54, %v1823_v54 }
 0x36c   :  { %667 = vbcast.lane.b32.xlu0 %v1826_v56, 320  ;;  %647 = vbcast.lane.b32.xlu1 %v640_v50, 328  ;;  %v409_v3 = vsub.f32 0.0, %v407_v1 }
 0x36e   :  { %v412_v4 = vmul.f32 1.442695, %v409_v3 }
 0x370   :  { %679 = vbcast.lane.b32.xlu0 %v1831_v58, 320  ;;  %659 = vbcast.lane.b32.xlu1 %v652_v49, 328  ;;  %1431 = vpow2.f32 %v412_v4 }
 0x374   :  { %691 = vbcast.lane.b32.xlu0 %v1836_v60, 320  ;;  %671 = vbcast.lane.b32.xlu1 %v1826_v56, 328 }
 0x378   :  { %703 = vbcast.lane.b32.xlu0 %v1843_v63, 320  ;;  %683 = vbcast.lane.b32.xlu1 %v1831_v58, 328 }
 0x37a   :  { %v1432_v7 = vpop.eup %1431 }
 0x37b   :  { %v423_v9 = vadd.f32 1.0, %v1432_v7  ;;  %v426_v13 = vmul.f32 -0.5, %v1432_v7  ;;  %v429_v17 = vand.u32 2147483647, %v1432_v7 }
 0x37c   :  { %715 = vbcast.lane.b32.xlu0 %v1849_v2, 320  ;;  %695 = vbcast.lane.b32.xlu1 %v1836_v60, 328 }
 0x37d   :  { %1433 = vlog2.f32 %v423_v9  ;;  %v427_v16 = vadd.f32 1.0, %v426_v13  ;;  %vm430_vm12 = vcmp.lt.f32.partialorder %v429_v17, 0.0004427343  ;;  %v1631_v17 = vmov 1966171168  }
 0x37e   :  { %1435 = vpow2.f32 %v1344_v28 }
 0x37f   :  { %v428_v20 = vmul.f32 %v1432_v7, %v427_v16 }
 0x380   :  { %791 = vbcast.lane.b32.xlu0 %v640_v50, 336  ;;  %707 = vbcast.lane.b32.xlu1 %v1843_v63, 328 }
 0x384   :  { %799 = vbcast.lane.b32.xlu0 %v652_v49, 336  ;;  %719 = vbcast.lane.b32.xlu1 %v1849_v2, 328 }
 0x387   :  { %v1434_v14 = vpop.eup %1433 }
 0x388   :  { %795 = vbcast.lane.b32.xlu1 %v640_v50, 344  ;;  %859 = vbcast.lane.b32.xlu0 %v856_v5, 320  ;;  %v425_v18 = vmul.f32 0.6931472, %v1434_v14  ;;  %v1436_v29 = vpop.eup %1435 }
 0x389   :  { %v1193_v31 = vadd.f32 1.0, %v1436_v29 }
 0x38a   :  { %v431_v21 = vsel %vm430_vm12, %v428_v20, %v425_v18  ;;  %v450_v18 = vunpack.c.l.s4 %v1631_v17 }
 0x38b   :  { %v433_v23 = vadd.f32 %v431_v21, %v401_v22  ;;  %1437 = vrcp.f32 %v1193_v31 }
 0x38c   :  { %803 = vbcast.lane.b32.xlu1 %v652_v49, 344  ;;  %871 = vbcast.lane.b32.xlu0 %v868_v6, 320  ;;  %v408_v49 = vsub.f32 0.0, %v406_v44  ;;  %v451_v25 = vunpack.c.0.s8 %v450_v18  ;;  %v497_v18 = vld [vmem:[#allocation7] sm:$0xff] }
 0x38d   :  { %v435_v24 = vsel %vm403_vm13, %v399_v62, %v433_v23 }
 0x38e   :  { %v410_v52 = vmul.f32 1.442695, %v408_v49  ;;  %v1957_v29 = vsub.s32 %v451_v25, %v1783_v43  ;;  %v498_v25 = vld [vmem:[#allocation7 + $0x8] sm:$0xff] }
 0x390   :  { %863 = vbcast.lane.b32.xlu1 %v856_v5, 328  ;;  %883 = vbcast.lane.b32.xlu0 %v880_v8, 320  ;;  %1439 = vpow2.f32 %v410_v52  ;;  %v1967_v52 = vsel %vm348_vm11, %v1805_v39, %v1876_v30 }
 0x391   :  { %2265 = vst [vmem:[#allocation29_spill] sm:$0xff] %v1967_v52 }
 0x394   :  { %875 = vbcast.lane.b32.xlu1 %v868_v6, 328  ;;  %895 = vbcast.lane.b32.xlu0 %v892_v10, 320 }
 0x395   :  { %v1438_v41 = vpop.eup %1437 }
 0x396   :  { %v1199_v48 = vmul.f32 %v1438_v41, %v1786_v45  ;;  %v1415_v45 = vld [vmem:[%s2247_s5] sm:$0xff]  }
 0x397   :  { %1385 = vmatpush3.bf16.msra.mxu0 %v1415_v45 }
 0x398   :  { %887 = vbcast.lane.b32.xlu1 %v880_v8, 328  ;;  %907 = vbcast.lane.b32.xlu0 %v904_v11, 320 }
 0x399   :  { %1386 = vmatprep.subr.bf16.mxu0 %v2251_v19 }
 0x39a   :  { %v1440_v0 = vpop.eup %1439 }
 0x39b   :  { %1387 = vmatpush3.bf16.msra.mxu0 %v1416_v59  ;;  %v414_v3 = vadd.f32 1.0, %v1440_v0 }
 0x39c   :  { %899 = vbcast.lane.b32.xlu1 %v892_v10, 328  ;;  %919 = vbcast.lane.b32.xlu0 %v916_v12, 320 }
 0x39d   :  { %1388 = vmatprep.subr.bf16.mxu0 %v2251_v19  ;;  %1441 = vlog2.f32 %v414_v3 }
 0x3a0   :  { %911 = vbcast.lane.b32.xlu1 %v904_v11, 328  ;;  %931 = vbcast.lane.b32.xlu0 %v928_v15, 320 }
 0x3a4   :  { %923 = vbcast.lane.b32.xlu1 %v916_v12, 328  ;;  %967 = vbcast.lane.b32.xlu0 %v856_v5, 336 }
 0x3a8   :  { %935 = vbcast.lane.b32.xlu1 %v928_v15, 328  ;;  %975 = vbcast.lane.b32.xlu0 %v868_v6, 336 }
 0x3ac   :  { %971 = vbcast.lane.b32.xlu1 %v856_v5, 344  ;;  %437 = vrot.lane.b32.xlu0 %v435_v24, %s1622_s15  ;;  %v400_v24 = vmax.f32 %v1823_v54, 0.0 }
 0x3b0   :  { %979 = vbcast.lane.b32.xlu1 %v868_v6, 344  ;;  %807 = vbcast.lane.b32.xlu0 %v1826_v56, 336 }
 0x3b4   :  { %811 = vbcast.lane.b32.xlu1 %v1826_v56, 344  ;;  %983 = vbcast.lane.b32.xlu0 %v880_v8, 336 }
 0x3b8   :  { %987 = vbcast.lane.b32.xlu1 %v880_v8, 344  ;;  %727 = vbcast.lane.b32.xlu0 %v724_v26, 320  ;;  %v417_v8 = vmul.f32 -0.5, %v1440_v0 }
 0x3bc   :  { %731 = vbcast.lane.b32.xlu1 %v724_v26, 328  ;;  %815 = vbcast.lane.b32.xlu0 %v1831_v58, 336 }
 0x3c0   :  { %819 = vbcast.lane.b32.xlu1 %v1831_v58, 344  ;;  %943 = vbcast.lane.b32.xlu0 %v940_v27, 320 }
 0x3c4   :  { %947 = vbcast.lane.b32.xlu1 %v940_v27, 328  ;;  %991 = vbcast.lane.b32.xlu0 %v892_v10, 336 }
 0x3c8   :  { %995 = vbcast.lane.b32.xlu1 %v892_v10, 344  ;;  %823 = vbcast.lane.b32.xlu0 %v1836_v60, 336 }
 0x3cc   :  { %827 = vbcast.lane.b32.xlu1 %v1836_v60, 344  ;;  %999 = vbcast.lane.b32.xlu0 %v904_v11, 336 }
 0x3d0   :  { %1003 = vbcast.lane.b32.xlu1 %v904_v11, 344  ;;  %831 = vbcast.lane.b32.xlu0 %v1843_v63, 336  ;;  %v1442_v11 = vpop.eup %1441 }
 0x3d1   :  { %v416_v16 = vmul.f32 0.6931472, %v1442_v11 }
 0x3d4   :  { %835 = vbcast.lane.b32.xlu1 %v1843_v63, 344  ;;  %1007 = vbcast.lane.b32.xlu0 %v916_v12, 336 }
 0x3d8   :  { %1011 = vbcast.lane.b32.xlu1 %v916_v12, 344  ;;  %839 = vbcast.lane.b32.xlu0 %v1849_v2, 336  ;;  %v418_v12 = vadd.f32 1.0, %v417_v8 }
 0x3da   :  { %v1879_v32 = vpop.permute.xlu0 %655  ;;  %v1881_v33 = vpop.permute.xlu1 %643  ;;  %v419_v20 = vmul.f32 %v1440_v0, %v418_v12 }
 0x3dc   :  { %843 = vbcast.lane.b32.xlu1 %v1849_v2, 344  ;;  %1015 = vbcast.lane.b32.xlu0 %v928_v15, 336 }
 0x3de   :  { %v1884_v34 = vpop.permute.xlu0 %667  ;;  %v1886_v35 = vpop.permute.xlu1 %647 }
 0x3e0   :  { %1019 = vbcast.lane.b32.xlu1 %v928_v15, 344  ;;  %847 = vbcast.lane.b32.xlu0 %v724_v26, 336  ;;  %v420_v15 = vand.u32 2147483647, %v1440_v0 }
 0x3e2   :  { %v1888_v36 = vpop.permute.xlu0 %679  ;;  %v1890_v37 = vpop.permute.xlu1 %659  ;;  %vm421_vm14 = vcmp.lt.f32.partialorder %v420_v15, 0.0004427343 }
 0x3e3   :  { %v422_v23 = vsel %vm421_vm14, %v419_v20, %v416_v16 }
 0x3e4   :  { %851 = vbcast.lane.b32.xlu1 %v724_v26, 344  ;;  %1023 = vbcast.lane.b32.xlu0 %v940_v27, 336  ;;  %v432_v28 = vadd.f32 %v422_v23, %v400_v24 }
 0x3e6   :  { %v1892_v38 = vpop.permute.xlu0 %691  ;;  %v1894_v40 = vpop.permute.xlu1 %671  ;;  %v434_v41 = vsel %vm402_vm15, %v1823_v54, %v432_v28 }
 0x3e8   :  { %1027 = vbcast.lane.b32.xlu1 %v940_v27, 344 }
 0x3ea   :  { %v1897_v46 = vpop.permute.xlu0 %703  ;;  %v1899_v47 = vpop.permute.xlu1 %683 }
 0x3eb   :  { %2255 = vst [vmem:[#allocation19_spill] sm:$0xff] %v1897_v46 }
 0x3ec   :  { %1203 = vrot.lane.b32.xlu1 %v1199_v48, %s1622_s15  ;;  %v1345_v48 = vmul.f32 -1.442695, %v1790_v53 }
 0x3ee   :  { %v1903_v50 = vpop.permute.xlu0 %715  ;;  %v1905_v51 = vpop.permute.xlu1 %695  ;;  %1443 = vpow2.f32 %v1345_v48 }
 0x3ef   :  { %2256 = vst [vmem:[#allocation20_spill] sm:$0xff] %v1903_v50  ;;  %2257 = vst [vmem:[#allocation21_spill] sm:$0xff] %v1905_v51 }
 0x3f2   :  { %v1907_v55 = vpop.permute.xlu0 %791  ;;  %v1909_v56 = vpop.permute.xlu1 %707 }
 0x3f3   :  { %2258 = vst [vmem:[#allocation22_spill] sm:$0xff] %v1909_v56 }
 0x3f6   :  { %v1911_v57 = vpop.permute.xlu0 %799  ;;  %v1913_v58 = vpop.permute.xlu1 %719 }
 0x3f7   :  { %2259 = vst [vmem:[#allocation23_spill] sm:$0xff] %v1913_v58 }
 0x3fa   :  { %v1921_v60 = vpop.permute.xlu1 %795  ;;  %v1923_v61 = vpop.permute.xlu0 %859 }
 0x3fe   :  { %v1926_v62 = vpop.permute.xlu1 %803  ;;  %v1928_v63 = vpop.permute.xlu0 %871 }
 0x402   :  { %v1931_v1 = vpop.permute.xlu1 %863  ;;  %v1933_v2 = vpop.permute.xlu0 %883 }
 0x406   :  { %v1935_v4 = vpop.permute.xlu1 %875  ;;  %v1937_v5 = vpop.permute.xlu0 %895 }
 0x40a   :  { %v1939_v6 = vpop.permute.xlu1 %887  ;;  %v1941_v7 = vpop.permute.xlu0 %907 }
 0x40e   :  { %v1943_v9 = vpop.permute.xlu1 %899  ;;  %v1945_v10 = vpop.permute.xlu0 %919 }
 0x40f   :  { %2260 = vst [vmem:[#allocation24_spill] sm:$0xff] %v1945_v10 }
 0x412   :  { %v1947_v13 = vpop.permute.xlu1 %911  ;;  %v1949_v14 = vpop.permute.xlu0 %931 }
 0x413   :  { %2261 = vst [vmem:[#allocation25_spill] sm:$0xff] %v1947_v13  ;;  %2262 = vst [vmem:[#allocation26_spill] sm:$0xff] %v1949_v14  ;;  %v2013_v14 = vpop.eup %1443 }
 0x414   :  { %2266 = vst [vmem:[#allocation30_spill] sm:$0xff] %v2013_v14 }
 0x416   :  { %v1951_v21 = vpop.permute.xlu1 %923  ;;  %v968_v22 = vpop.permute.xlu0 %967 }
 0x417   :  { %2263 = vst [vmem:[#allocation27_spill] sm:$0xff] %v1951_v21  ;;  %v1977_v12 = vsel %vm348_vm11, %v1907_v55, %v968_v22 }
 0x41a   :  { %v1954_v26 = vpop.permute.xlu1 %935  ;;  %v976_v27 = vpop.permute.xlu0 %975 }
 0x41b   :  { %2264 = vst [vmem:[#allocation28_spill] sm:$0xff] %v1954_v26  ;;  %v1983_v17 = vsel %vm348_vm11, %v1911_v57, %v976_v27 }
 0x41e   :  { %v972_v31 = vpop.permute.xlu1 %971  ;;  %v438_v44 = vpop.permute.xlu0 %437 }
 0x41f   :  { %v440_v49 = vsel %vm348_vm11, %v434_v41, %v438_v44  ;;  %v1995_v57 = vsel %vm348_vm11, %v1921_v60, %v972_v31 }
 0x420   :  { %v448_v45 = vcombine.high %v440_v49, %v440_v49  ;;  %v455_v43 = vrot.slane %v440_v49, %v1957_v29  ;;  %v446_v59 = vmul.f32 %v1967_v52, %v440_v49 }
 0x422   :  { %v462_v0 = vrot.slane %v448_v45, %v1957_v29  ;;  %v463_v3 = vcombine.high %v455_v43, %v455_v43  ;;  %v471_v54 = vrot.slane %v455_v43, %v1957_v29  ;;  %v980_v8 = vpop.permute.xlu1 %979  ;;  %v1973_v11 = vpop.permute.xlu0 %807  ;;  %v588_v23 = vcombine.high %v446_v59, %v446_v59 }
 0x423   :  { %v595_v24 = vrot.slane %v446_v59, %v1957_v29  ;;  %v2001_v45 = vsel %vm348_vm11, %v1926_v62, %v980_v8 }
 0x424   :  { %v464_v39 = vcombine.high %v462_v0, %v462_v0  ;;  %v478_v30 = vrot.slane %v462_v0, %v1957_v29  ;;  %v485_v15 = vrot.slane %v463_v3, %v1957_v29  ;;  %v493_v16 = vcombine.high %v471_v54, %v471_v54 }
 0x425   :  { %v502_v20 = vrot.slane %v471_v54, %v1811_v42  ;;  %v602_v60 = vrot.slane %v588_v23, %v1957_v29  ;;  %v611_v19 = vrot.slane %v595_v24, %v1957_v29 }
 0x426   :  { %v492_v55 = vrot.slane %v464_v39, %v1957_v29  ;;  %v494_v22 = vcombine.high %v478_v30, %v478_v30  ;;  %v495_v28 = vcombine.high %v485_v15, %v485_v15  ;;  %v506_v41 = vrot.slane %v485_v15, %v1811_v42  ;;  %v1989_v44 = vpop.permute.xlu1 %811  ;;  %v1991_v48 = vpop.permute.xlu0 %983 }
 0x427   :  { %v510_v27 = vrot.slane %v493_v16, %v1811_v42  ;;  %v518_v49 = vrot.slane %v478_v30, %v1811_v42  ;;  %v539_v3 = vmul.f32 %v502_v20, %v497_v18  ;;  %v540_v39 = vmul.f32 %v502_v20, %v498_v25 }
 0x428   :  { %v496_v43 = vcombine.high %v492_v55, %v492_v55  ;;  %v514_v59 = vrot.slane %v495_v28, %v1811_v42  ;;  %v522_v0 = vrot.slane %v492_v55, %v1811_v42  ;;  %v526_v54 = vrot.slane %v494_v22, %v1811_v42 }
 0x429   :  { %v541_v15 = vmul.f32 %v506_v41, %v497_v18  ;;  %v542_v16 = vmul.f32 %v506_v41, %v498_v25  ;;  %v603_v30 = vcombine.high %v595_v24, %v595_v24  ;;  %v543_v28 = vmul.f32 %v510_v27, %v497_v18 }
 0x42a   :  { %v530_v31 = vrot.slane %v496_v43, %v1811_v42  ;;  %v2009_v62 = vpop.permute.xlu1 %987  ;;  %v2011_v8 = vpop.permute.xlu0 %727  ;;  %v544_v53 = vmul.f32 %v510_v27, %v498_v25  ;;  %v545_v55 = vmul.f32 %v514_v59, %v497_v18  ;;  %v546_v52 = vmul.f32 %v514_v59, %v498_v25 }
 0x42b   :  { %v547_v26 = vmul.f32 %v518_v49, %v497_v18  ;;  %v548_v22 = vmul.f32 %v518_v49, %v498_v25  ;;  %v549_v20 = vmul.f32 %v522_v0, %v497_v18  ;;  %v555_v58 = vmul.f32 1.442695, %v539_v3 }
 0x42c   :  { %v550_v23 = vmul.f32 %v522_v0, %v498_v25  ;;  %v551_v43 = vmul.f32 %v526_v54, %v497_v18  ;;  %v557_v41 = vmul.f32 1.442695, %v540_v39  ;;  %v559_v50 = vmul.f32 1.442695, %v541_v15 }
 0x42d   :  { %v552_v21 = vmul.f32 %v526_v54, %v498_v25  ;;  %v553_v24 = vmul.f32 %v530_v31, %v497_v18  ;;  %1445 = vpow2.f32 %v555_v58  ;;  %v561_v56 = vmul.f32 1.442695, %v542_v16 }
 0x42e   :  { %v2015_v10 = vpop.permute.xlu1 %731  ;;  %v2017_v46 = vpop.permute.xlu0 %815  ;;  %v554_v27 = vmul.f32 %v530_v31, %v498_v25  ;;  %1447 = vpow2.f32 %v557_v41  ;;  %v563_v59 = vmul.f32 1.442695, %v543_v28  ;;  %v565_v49 = vmul.f32 1.442695, %v544_v53 }
 0x42f   :  { %v567_v13 = vmul.f32 1.442695, %v545_v55  ;;  %v569_v3 = vmul.f32 1.442695, %v546_v52  ;;  %v571_v51 = vmul.f32 1.442695, %v547_v26  ;;  %v604_v14 = vcombine.high %v602_v60, %v602_v60 }
 0x430   :  { %1449 = vpow2.f32 %v559_v50  ;;  %v573_v0 = vmul.f32 1.442695, %v548_v22  ;;  %v575_v39 = vmul.f32 1.442695, %v549_v20  ;;  %v577_v15 = vmul.f32 1.442695, %v550_v23 }
 0x431   :  { %1451 = vpow2.f32 %v561_v56  ;;  %v579_v18 = vmul.f32 1.442695, %v551_v43  ;;  %v618_v58 = vrot.slane %v602_v60, %v1957_v29  ;;  %v625_v54 = vrot.slane %v603_v30, %v1957_v29 }
 0x432   :  { %v2021_v16 = vpop.permute.xlu1 %819  ;;  %v2023_v25 = vpop.permute.xlu0 %943  ;;  %1453 = vpow2.f32 %v563_v59  ;;  %v581_v53 = vmul.f32 1.442695, %v552_v21  ;;  %v633_v31 = vcombine.high %v611_v19, %v611_v19  ;;  %v736_v26 = vrot.slane %v611_v19, %v1811_v42 }
 0x433   :  { %1455 = vpow2.f32 %v565_v49  ;;  %v583_v50 = vmul.f32 1.442695, %v553_v24  ;;  %v2027_v52 = vrot.slane %v604_v14, %v1957_v29  ;;  %v635_v56 = vcombine.high %v625_v54, %v625_v54 }
 0x434   :  { %1457 = vpow2.f32 %v567_v13  ;;  %v585_v28 = vmul.f32 1.442695, %v554_v27  ;;  %v740_v60 = vrot.slane %v625_v54, %v1811_v42  ;;  %v2033_v30 = vsel %vm348_vm11, %v1973_v11, %v1991_v48 }
 0x435   :  { %1459 = vpow2.f32 %v569_v3  ;;  %v634_v21 = vcombine.high %v618_v58, %v618_v58  ;;  %v744_v55 = vrot.slane %v633_v31, %v1811_v42  ;;  %v773_v19 = vmul.f32 %v736_v26, %v1881_v33 }
 0x436   :  { %v2037_v22 = vpop.permute.xlu1 %947  ;;  %v2039_v14 = vpop.permute.xlu0 %991  ;;  %1461 = vpow2.f32 %v571_v51  ;;  %v2042_v13 = vrot.slane %v618_v58, %v1811_v42  ;;  %v949_v29 = vmul.f32 %v1923_v61, %v736_v26  ;;  %v774_v20 = vmul.f32 %v736_v26, %v1886_v35 }
 0x437   :  { %v1446_v11 = vpop.eup %1445  ;;  %1463 = vpow2.f32 %v573_v0  ;;  %v2047_v48 = vrot.slane %v635_v56, %v1811_v42  ;;  %v2051_v33 = vrot.slane %v2027_v52, %v1811_v42  ;;  %v950_v23 = vmul.f32 %v1931_v1, %v736_v26 }
 0x438   :  { %v1448_v43 = vpop.eup %1447  ;;  %1465 = vpow2.f32 %v575_v39  ;;  %v1061_v51 = vmul.f32 0.0, %v1446_v11  ;;  %v775_v41 = vmul.f32 %v740_v60, %v1879_v32  ;;  %v951_v61 = vmul.f32 %v1928_v63, %v740_v60 }
 0x439   :  { %v776_v35 = vmul.f32 %v740_v60, %v1890_v37  ;;  %v952_v24 = vmul.f32 %v1935_v4, %v740_v60  ;;  %v1029_v27 = vsel %vm348_vm11, %v773_v19, %v949_v29  ;;  %v1062_v59 = vmul.f32 0.0, %v1448_v43 }
 0x43a   :  { %v2059_v49 = vpop.permute.xlu1 %995  ;;  %v2061_v3 = vpop.permute.xlu0 %823  ;;  %1467 = vpow2.f32 %v577_v15  ;;  %v2064_v1 = vrot.slane %v634_v21, %v1811_v42  ;;  %v1030_v32 = vsel %vm348_vm11, %v774_v20, %v950_v23  ;;  %v1063_v39 = vadd.f32 %v1061_v51, %v1029_v27 }
 0x43b   :  { %v1450_v0 = vpop.eup %1449  ;;  %1469 = vpow2.f32 %v579_v18  ;;  %v1064_v37 = vadd.f32 %v1062_v59, %v1030_v32  ;;  %v777_v4 = vmul.f32 %v744_v55, %v1884_v34  ;;  %v953_v58 = vmul.f32 %v1933_v2, %v744_v55 }
 0x43c   :  { %v1452_v63 = vpop.eup %1451  ;;  %1471 = vpow2.f32 %v581_v53  ;;  %v1031_v31 = vsel %vm348_vm11, %v775_v41, %v951_v61  ;;  %v1065_v26 = vmul.f32 %v1063_v39, %v1977_v12  ;;  %v1074_v15 = vmul.f32 %v1450_v0, %v1063_v39 }
 0x43d   :  { %v1454_v54 = vpop.eup %1453  ;;  %1473 = vpow2.f32 %v583_v50  ;;  %v1032_v60 = vsel %vm348_vm11, %v776_v35, %v952_v24  ;;  %v1066_v21 = vmul.f32 %v1064_v37, %v1995_v57  ;;  %v1075_v19 = vmul.f32 %v1452_v63, %v1064_v37 }
 0x43e   :  { %v1456_v56 = vpop.eup %1455  ;;  %v2073_v18 = vpop.permute.xlu1 %827  ;;  %v1076_v2 = vadd.f32 %v1074_v15, %v1031_v31  ;;  %v778_v53 = vmul.f32 %v744_v55, %v1894_v40  ;;  %v954_v20 = vmul.f32 %v1939_v6, %v744_v55  ;;  %v636_v12 = vcombine.high %v2027_v52, %v2027_v52 }
 0x43f   :  { %v2075_v29 = vpop.permute.xlu0 %999  ;;  %v1458_v34 = vpop.eup %1457  ;;  %1475 = vpow2.f32 %v585_v28  ;;  %v1067_v50 = vadd.f32 %v1066_v21, %v1065_v26  ;;  %v1077_v23 = vadd.f32 %v1075_v19, %v1032_v60  ;;  %v1033_v57 = vsel %vm348_vm11, %v777_v4, %v953_v58 }
 0x440   :  { %v1460_v11 = vpop.eup %1459  ;;  %v1078_v51 = vmul.f32 %v1076_v2, %v1983_v17  ;;  %v1087_v41 = vmul.f32 %v1454_v54, %v1076_v2  ;;  %v779_v61 = vmul.f32 %v2047_v48, %v1888_v36  ;;  %v955_v40 = vmul.f32 %v1937_v5, %v2047_v48 }
 0x441   :  { %v1462_v43 = vpop.eup %1461  ;;  %v1068_v55 = vrot.slane %v1067_v50, 4  ;;  %v1079_v52 = vmul.f32 %v1077_v23, %v2001_v45  ;;  %v1088_v35 = vmul.f32 %v1456_v56, %v1077_v23  ;;  %v2089_v28 = vrot.slane %v636_v12, %v1811_v42 }
 0x442   :  { %v1464_v6 = vpop.eup %1463  ;;  %v2091_v24 = vpop.permute.xlu1 %1003  ;;  %v1089_v59 = vadd.f32 %v1087_v41, %v1033_v57  ;;  %v1034_v36 = vsel %vm348_vm11, %v778_v53, %v954_v20  ;;  %v1050_v5 = vsel %vm348_vm11, %v1989_v44, %v2009_v62  ;;  %v780_v45 = vmul.f32 %v2047_v48, %v1899_v47 }
 0x443   :  { %v2093_v27 = vpop.permute.xlu0 %831  ;;  %v2095_v17 = vpop.eup %1465  ;;  %v1069_v0 = vadd.f32 %v1068_v55, %v1067_v50  ;;  %v1080_v32 = vadd.f32 %v1079_v52, %v1078_v51  ;;  %v1090_v42 = vadd.f32 %v1088_v35, %v1034_v36  ;;  %v1051_v39 = vsel %vm348_vm11, %v2017_v46, %v2039_v14 }
 0x444   :  { %v2106_v63 = vpop.eup %1467  ;;  %v1091_v37 = vmul.f32 %v1089_v59, %v2033_v30  ;;  %v1035_v4 = vsel %vm348_vm11, %v779_v61, %v955_v40  ;;  %v1100_v58 = vmul.f32 %v1458_v34, %v1089_v59  ;;  %v956_v44 = vmul.f32 %v1943_v9, %v2047_v48  ;;  %v2267_v40 = vld [vmem:[#allocation21_spill] sm:$0xff] }
 0x445   :  { %v2112_v62 = vpop.eup %1469  ;;  %v1070_v47 = vrot.slane %v1069_v0, 2  ;;  %v1081_v54 = vrot.slane %v1080_v32, 4  ;;  %v1092_v31 = vmul.f32 %v1090_v42, %v1050_v5  ;;  %v2116_v26 = vmul.f32 %v2089_v28, %v2011_v8 }
 0x446   :  { %v2118_v46 = vpop.permute.xlu1 %835  ;;  %v2120_v15 = vpop.eup %1471  ;;  %v2124_v30 = vmul.f32 %v2023_v25, %v2089_v28  ;;  %v1102_v9 = vadd.f32 %v1100_v58, %v1035_v4  ;;  %v1036_v48 = vsel %vm348_vm11, %v780_v45, %v956_v44  ;;  %v1101_v56 = vmul.f32 %v1460_v11, %v1090_v42 }
 0x447   :  { %v1008_v14 = vpop.permute.xlu0 %1007  ;;  %v2127_v60 = vpop.eup %1473  ;;  %v1071_v21 = vadd.f32 %v1070_v47, %v1069_v0  ;;  %v1082_v19 = vadd.f32 %v1081_v54, %v1080_v32  ;;  %v1093_v8 = vadd.f32 %v1092_v31, %v1091_v37  ;;  %v781_v34 = vmul.f32 %v2042_v13, %v1892_v38  ;;  %v2270_v47 = vld [vmem:[#allocation24_spill] sm:$0xff] }
 0x448   :  { %v1104_v2 = vmul.f32 %v1102_v9, %v1051_v39  ;;  %v1103_v53 = vadd.f32 %v1101_v56, %v1036_v48  ;;  %v957_v20 = vmul.f32 %v1941_v7, %v2042_v13  ;;  %v1113_v12 = vmul.f32 %v1462_v43, %v1102_v9  ;;  %v2268_v7 = vld [vmem:[#allocation25_spill] sm:$0xff]  ;;  %v2269_v39 = vld [vmem:[#allocation19_spill] sm:$0xff]  ;;  %v2271_v9 = vld [vmem:[#allocation22_spill] sm:$0xff] }
 0x449   :  { %v2133_v25 = vpop.eup %1475  ;;  %v1072_v50 = vrot.slane %v1071_v21, 1  ;;  %v1083_v23 = vrot.slane %v1082_v19, 2  ;;  %v1094_v57 = vrot.slane %v1093_v8, 4  ;;  %v1052_v11 = vsel %vm348_vm11, %v2021_v16, %v2059_v49 }
 0x44a   :  { %v1012_v51 = vpop.permute.xlu1 %1011  ;;  %v1105_v61 = vmul.f32 %v1103_v53, %v1052_v11  ;;  %v1037_v38 = vsel %vm348_vm11, %v781_v34, %v957_v20  ;;  %v782_v55 = vmul.f32 %v2042_v13, %v2267_v40  ;;  %v958_v43 = vmul.f32 %v2268_v7, %v2042_v13 }
 0x44b   :  { %v840_v41 = vpop.permute.xlu0 %839  ;;  %v1084_v52 = vadd.f32 %v1083_v23, %v1082_v19  ;;  %v1095_v35 = vadd.f32 %v1094_v57, %v1093_v8  ;;  %v1115_v59 = vadd.f32 %v1113_v12, %v1037_v38  ;;  %v1053_v36 = vsel %vm348_vm11, %v2061_v3, %v2075_v29  ;;  %v2272_v8 = vld [vmem:[#allocation27_spill] sm:$0xff]  ;;  %v2274_v38 = vld [vmem:[#allocation26_spill] sm:$0xff] }
 0x44c   :  { %v1073_v5 = vadd.f32 %v1072_v50, %v1071_v21  ;;  %v1106_v16 = vadd.f32 %v1105_v61, %v1104_v2  ;;  %v1038_v49 = vsel %vm348_vm11, %v782_v55, %v958_v43  ;;  %v1114_v45 = vmul.f32 %v1464_v6, %v1103_v53  ;;  %v2273_v61 = vld [vmem:[#allocation20_spill] sm:$0xff] }
 0x44d   :  { %v1085_v0 = vrot.slane %v1084_v52, 1  ;;  %v1096_v32 = vrot.slane %v1095_v35, 2  ;;  %v1117_v42 = vmul.f32 %v1115_v59, %v1053_v36  ;;  %v783_v37 = vmul.f32 %v2051_v33, %v2269_v39 }
 0x44e   :  { %v844_v4 = vpop.permute.xlu1 %843  ;;  %v1107_v58 = vrot.slane %v1106_v16, 4  ;;  %v1116_v44 = vadd.f32 %v1114_v45, %v1038_v49  ;;  %v959_v54 = vmul.f32 %v2270_v47, %v2051_v33  ;;  %v1126_v3 = vmul.f32 %v2095_v17, %v1115_v59 }
 0x44f   :  { %v1016_v13 = vpop.permute.xlu0 %1015  ;;  %v1086_v29 = vadd.f32 %v1085_v0, %v1084_v52  ;;  %v1097_v31 = vadd.f32 %v1096_v32, %v1095_v35  ;;  %v1054_v6 = vsel %vm348_vm11, %v2073_v18, %v2091_v24  ;;  %v784_v48 = vmul.f32 %v2051_v33, %v2271_v9  ;;  %v2276_v35 = vld [vmem:[#allocation28_spill] sm:$0xff] }
 0x450   :  { %v1108_v56 = vadd.f32 %v1107_v58, %v1106_v16  ;;  %v1118_v21 = vmul.f32 %v1116_v44, %v1054_v6  ;;  %v1039_v19 = vsel %vm348_vm11, %v783_v37, %v959_v54  ;;  %v960_v34 = vmul.f32 %v2272_v8, %v2051_v33 }
 0x451   :  { %v1166_v2 = vsel %vm1165_vm1, %v1073_v5, %v1086_v29  ;;  %v1098_v17 = vrot.slane %v1097_v31, 1  ;;  %v1128_v53 = vadd.f32 %v1126_v3, %v1039_v19  ;;  %v1055_v20 = vsel %vm348_vm11, %v2093_v27, %v1008_v14 }
 0x452   :  { %v1020_v12 = vpop.permute.xlu1 %1019  ;;  %v1109_v50 = vrot.slane %v1108_v56, 2  ;;  %v1119_v18 = vadd.f32 %v1118_v21, %v1117_v42  ;;  %v1056_v24 = vsel %vm348_vm11, %v2118_v46, %v1012_v51  ;;  %v1127_v23 = vmul.f32 %v2106_v63, %v1116_v44  ;;  %v2275_v51 = vld [vmem:[#allocation23_spill] sm:$0xff] }
 0x453   :  { %v1130_v57 = vmul.f32 %v1128_v53, %v1055_v20  ;;  %v1040_v11 = vsel %vm348_vm11, %v784_v48, %v960_v34  ;;  %v785_v33 = vmul.f32 %v2064_v1, %v2273_v61  ;;  %v961_v40 = vmul.f32 %v2274_v38, %v2064_v1  ;;  %v848_v55 = vpop.permute.xlu0 %847  ;;  %v1417_v61 = vld [vmem:[%s2247_s5 + $0x10] sm:$0xff]  }
 0x454   :  { %v1110_v7 = vadd.f32 %v1109_v50, %v1108_v56  ;;  %v1120_v27 = vrot.slane %v1119_v18, 4  ;;  %v1129_v14 = vadd.f32 %v1127_v23, %v1040_v11  ;;  %v1139_v43 = vmul.f32 %v2112_v62, %v1128_v53  ;;  %1389 = vmatpush3.bf16.msra.mxu0 %v1417_v61 }
 0x455   :  { %v1099_v52 = vadd.f32 %v1098_v17, %v1097_v31  ;;  %v1041_v46 = vsel %vm348_vm11, %v785_v33, %v961_v40  ;;  %v786_v63 = vmul.f32 %v2064_v1, %v2275_v51  ;;  %v962_v59 = vmul.f32 %v2276_v35, %v2064_v1 }
 0x456   :  { %v852_v36 = vpop.permute.xlu1 %851  ;;  %v1111_v5 = vrot.slane %v1110_v7, 1  ;;  %v1121_v16 = vadd.f32 %v1120_v27, %v1119_v18  ;;  %v1131_v49 = vmul.f32 %v1129_v14, %v1056_v24  ;;  %v1141_v45 = vadd.f32 %v1139_v43, %v1041_v46  ;;  %v2277_v18 = vld [vmem:[#allocation30_spill] sm:$0xff] }
 0x457   :  { %v964_v0 = vmul.f32 %v2037_v22, %v2089_v28  ;;  %v1057_v32 = vsel %vm348_vm11, %v840_v41, %v1016_v13  ;;  %v1042_v62 = vsel %vm348_vm11, %v786_v63, %v962_v59  ;;  %v1140_v42 = vmul.f32 %v2120_v15, %v1129_v14  ;;  %v1024_v3 = vpop.permute.xlu0 %1023  ;;  %v1418_v63 = vld [vmem:[%s2247_s5 + $0x18] sm:$0xff]   ;;  %s1632_s5 = smov [#allocation11]  }
 0x458   :  { %v1112_v39 = vadd.f32 %v1111_v5, %v1110_v7  ;;  %v1122_v37 = vrot.slane %v1121_v16, 2  ;;  %v1132_v58 = vadd.f32 %v1131_v49, %v1130_v57  ;;  %v1058_v44 = vsel %vm348_vm11, %v844_v4, %v1020_v12  ;;  %v2279_v59 = vld [vmem:[#allocation29_spill] sm:$0xff]  ;;  %s1307_s30 = sshll.u32 %s1632_s5, 4  ;;  %s1308_s30 = int_to_ptr.vmem [resolvable:$true] %s1307_s30 }
 0x459   :  { %v788_v1 = vmul.f32 %v2089_v28, %v2015_v10  ;;  %v1142_v47 = vadd.f32 %v1140_v42, %v1042_v62  ;;  %v1152_v54 = vmul.f32 %v2127_v60, %v1141_v45  ;;  %v1168_v22 = vsel %vm1167_vm3, %v1166_v2, %v1099_v52  ;;  %v1343_v52 = vld [vmem:[#allocation8 + $0x2] ss:$0 sm:$0xff]  ;;  %s1567_s9 = scalar_lea.vmem %s1308_s30, 256  ;;  %p1572_p5 = scmp.lt.s32.totalorder %s1308_s30, %s1308_s30 }
 0x45a   :  { %v1028_v29 = vpop.permute.xlu1 %1027  ;;  %v1043_v41 = vsel %vm348_vm11, %v2116_v26, %v2124_v30  ;;  %v1123_v15 = vadd.f32 %v1122_v37, %v1121_v16  ;;  %v1133_v13 = vrot.slane %v1132_v58, 4  ;;  %v1169_v31 = vsel %vm204_vm2, %v1168_v22, %v1112_v39  ;;  %p1568_p4 = scmp.ne.s32.totalorder %s1308_s30, %s1567_s9  ;;  %p1573_p6 = scmp.lt.s32.totalorder %s1567_s9, %s1567_s9 }
 0x45b   :  { %v1044_v4 = vsel %vm348_vm11, %v788_v1, %v964_v0  ;;  %v1143_v6 = vmul.f32 %v1141_v45, %v1057_v32  ;;  %v1144_v9 = vmul.f32 %v1142_v47, %v1058_v44  ;;  %v1153_v10 = vmul.f32 %v2133_v25, %v1142_v47  ;;  %v2280_v45 = vld [vmem:[#allocation18_spill] sm:$0xff] }
 0x45c   :  { %v1124_v28 = vrot.slane %v1123_v15, 1  ;;  %v1134_v60 = vadd.f32 %v1133_v13, %v1132_v58  ;;  %v1059_v48 = vsel %vm348_vm11, %v848_v55, %v1024_v3  ;;  %v1060_v56 = vsel %vm348_vm11, %v852_v36, %v1028_v29  ;;  %p1574_p7 = por %p1573_p6, %p1572_p5 }
 0x45d   :  { %v1145_v21 = vadd.f32 %v1144_v9, %v1143_v6  ;;  %v1154_v19 = vadd.f32 %v1152_v54, %v1043_v41  ;;  %v1155_v8 = vadd.f32 %v1153_v10, %v1044_v4  ;;  %v1194_v24 = vadd.f32 1.0, %v2277_v18 }
 0x45e   :  { %v1125_v26 = vadd.f32 %v1124_v28, %v1123_v15  ;;  %v1135_v30 = vrot.slane %v1134_v60, 2  ;;  %vm1172_vm2 = vcmask 1044480   ;;  %v2278_v27 = vmov 0.0   ;;  %v1204_v62 = vpop.permute.xlu1 %1203  ;;  %p1575_p8 = pnand %p1574_p7, %p1568_p4 }
 0x45f   :  { %v1146_v34 = vrot.slane %v1145_v21, 4  ;;  %v1156_v2 = vmul.f32 %v1154_v19, %v1059_v48  ;;  %v1157_v17 = vmul.f32 %v1155_v8, %v1060_v56  ;;  %1477 = vrcp.f32 %v1194_v24  ;;  %1390 = vmatprep.subr.bf16.mxu0 %v2278_v27 }
 0x460   :  { %v1136_v53 = vadd.f32 %v1135_v30, %v1134_v60  ;;  %v1171_v20 = vsel %vm1170_vm4, %v1169_v31, %v1125_v26  ;;  %1391 = vmatpush3.bf16.msra.mxu0 %v1418_v63  ;;  %v1181_v36 = vmul.f32 %v1343_v52, %v2279_v59 }
 0x461   :  { %v1147_v12 = vadd.f32 %v1146_v34, %v1145_v21  ;;  %v1158_v50 = vadd.f32 %v1157_v17, %v1156_v2 }
 0x462   :  { %v1137_v25 = vrot.slane %v1136_v53, 1 }
 0x463   :  { %v1148_v23 = vrot.slane %v1147_v12, 2  ;;  %v1159_v57 = vrot.slane %v1158_v50, 4 }
 0x464   :  { %v1138_v11 = vadd.f32 %v1137_v25, %v1136_v53 }
 0x465   :  { %v1149_v33 = vadd.f32 %v1148_v23, %v1147_v12  ;;  %v1160_v38 = vadd.f32 %v1159_v57, %v1158_v50 }
 0x466   :  { %v1173_v40 = vsel %vm1172_vm2, %v1171_v20, %v1138_v11 }
 0x467   :  { %v1150_v55 = vrot.slane %v1149_v33, 1  ;;  %v1161_v7 = vrot.slane %v1160_v38, 2 }
 0x469   :  { %v1162_v14 = vadd.f32 %v1161_v7, %v1160_v38  ;;  %v1151_v43 = vadd.f32 %v1150_v55, %v1149_v33  ;;  %v1478_v49 = vpop.eup %1477 }
 0x46a   :  { %v1200_v0 = vmul.f32 %v1478_v49, %v2280_v45 }
 0x46b   :  { %v1163_v46 = vrot.slane %v1162_v14, 1  ;;  %v1174_v51 = vsel %vm282_vm7, %v1173_v40, %v1151_v43 }
 0x46d   :  { %v1164_v35 = vadd.f32 %v1163_v46, %v1162_v14 }
 0x46f   :  { %v1175_v5 = vsel %vm253_vm5, %v1174_v51, %v1164_v35 }
 0x470   :  { %v1182_v16 = vadd.f32 %v1181_v36, %v1175_v5 }
 0x472   :  { %1184 = vrot.lane.b32.xlu0 %v1182_v16, %s1622_s15  ;;  %v1209_v39 = vmul.f32 %v1204_v62, %v1182_v16 }
 0x476   :  { %1205 = vrot.lane.b32.xlu0 %v1200_v0, %s1622_s15 }
 0x4e4   :  { %v1185_v32 = vpop.permute.xlu0 %1184 }
 0x4e8   :  { %v1206_v42 = vpop.permute.xlu0 %1205 }
 0x4e9   :  { %v1210_v37 = vmul.f32 %v1206_v42, %v1185_v32 }
 0x4eb   :  { %v1211_v58 = vpack.c.bf16 %v1210_v37, %v1209_v39 }
 0x4ed   :  { %1393 = vmatmul.mubr.msk.bf16.vlgmr.msra.gmra.mrb[4].mxu0 %vm348_vm11, %v1211_v58 }
 0x4ee   :  { %1578 = shalt.err (!%p1575_p8)
}
 0x4ef   :  { %s1579_s4 = scalar_lea.hbm %s2250_s8, 256 }
 0x4f0   :  { %p1580_p9 = scmp.ne.s32.totalorder %s2250_s8, %s1579_s4  ;;  %p1583_p10 = scmp.lt.u32.totalorder %s1579_s4, %s2250_s8 }
 0x4f2   :  { %p1585_p11 = pnand %p1583_p10, %p1580_p9 }
 0x4f4   :  { %1588 = shalt.err (!%p1585_p11)
}
 0x4f5   :  { %1313 = dma.vmem_to_hbm [thread:$0]  %s1308_s30, 256, %s2250_s8, [#allocation12], %s1625_s2, %s1625_s2, %s1626_s28  }
 0x4f6   :  { %s1633_s6 = smov [#allocation10]  }
 0x4f7   :  { %s1295_s13 = sshll.u32 %s1633_s6, 4  ;;  %s1296_s13 = int_to_ptr.vmem [resolvable:$true] %s1295_s13 }
 0x4f8   :  { %s1589_s18 = scalar_lea.vmem %s1296_s13, 256  ;;  %p1594_p13 = scmp.lt.s32.totalorder %s1296_s13, %s1296_s13 }
 0x4f9   :  { %p1590_p12 = scmp.ne.s32.totalorder %s1296_s13, %s1589_s18  ;;  %p1595_p0 = scmp.lt.s32.totalorder %s1589_s18, %s1589_s18 }
 0x4fb   :  { %p1596_p1 = por %p1595_p0, %p1594_p13 }
 0x4fd   :  { %p1597_p2 = pnand %p1596_p1, %p1590_p12 }
 0x5c0   :  { %v1281_v44 = vpop.f32.mrb[4].mxu0 }
 0x5c1   :  { %1288 = vst.msk [vmem:[#allocation10] sm:$0xff] %vm92_vm0, %v1281_v44  ;;  %v1394_v1 = vpop.f32.mrb[5].mxu0 }
 0x5c2   :  { %v1284_v47 = vpop.f32.mrb[6].mxu0 }
 0x5c3   :  { %1289 = vst.msk [vmem:[#allocation10 + $0x8] sm:$0xff] %vm92_vm0, %v1284_v47  ;;  %v1395_v54 = vpop.f32.mrb[7].mxu0 }
 0x5c4   :  { %1600 = shalt.err (!%p1597_p2)
}
 0x5c5   :  { %s1601_s21 = scalar_lea.hbm %s2249_s7, 256 }
 0x5c6   :  { %p1602_p3 = scmp.ne.s32.totalorder %s2249_s7, %s1601_s21  ;;  %p1605_p4 = scmp.lt.u32.totalorder %s1601_s21, %s2249_s7 }
 0x5c8   :  { %p1607_p5 = pnand %p1605_p4, %p1602_p3 }
 0x5ca   :  { %1610 = shalt.err (!%p1607_p5)
}
 0x5cb   :  { %1301 = dma.vmem_to_hbm [thread:$0]  %s1296_s13, 256, %s2249_s7, [#allocation4], %s1625_s2, %s1625_s2, %s1626_s28  }
 0x5cc   :  { %1617 = dma.done.wait [#allocation4], 256  }
 0x5cd   :  { %1618 = vsyncadd [#allocation4], 4294967040 }
 0x5ce   :  { %1619 = dma.done.wait [#allocation12], 256  }
 0x5cf   :  { %1620 = vsyncadd [#allocation12], 4294967040 }
 0x5d0   :  { %1320 = vsyncpa [#allocation3], 1 }
 0x5d1   :  { %1321 = vsyncpa [#allocation6], 1 }
 0x5d2   :  { %1322 = vsyncpa [#allocation9], 1 }
 0x5d3   :  { %1323 = vsyncpa [#allocation4], 1 }
 0x5d4   :  { %1324 = vsyncpa [#allocation12], 1 }

</bundles_post_ra>
